<compile_context>
chip_gen: v7x
topology: tpu7x:2x2x1
jax: 0.10.0
libtpu: 0.0.40
codegen_flags: <defaults>
</compile_context>

<pallas_src>
import functools

import numpy as np
import jax
import jax.numpy as jnp
from jax.experimental import pallas as pl
from jax.experimental.pallas import tpu as pltpu


# ----------------------------------------------------------------------------
# Fused Conv3d (kxkxk, stride 1, same padding, no bias) + BatchNorm3d kernel.
# Single grid step: builds the im2col slab for the whole batch in VMEM scratch,
# one MXU matmul, fused BN stats + normalization, lane-dense output.
# ----------------------------------------------------------------------------
def _cb_kernel(x_ref, w_ref, mask_ref, g_ref, b_ref, out_ref, slab_ref, *,
               N, D, H, W, Cin, k, eps):
    DHW = D * H * W
    total = N * DHW
    k3 = k * k * k
    p = (k - 1) // 2
    inv_count = 1.0 / float(total)

    # Lane-concatenated whole batch: (Cin, N*DHW).  512-lane-aligned concat.
    xw = jnp.concatenate([x_ref[n] for n in range(N)], axis=1)

    # Flattened tap offsets (kd, kh, kw nested — matches the weight reshape).
    offs = [(kd - p) * H * W + (kh - p) * W + (kw - p)
            for kd in range(k) for kh in range(k) for kw in range(k)]

    def tap(t):
        s = (-offs[t]) % total
        return xw if s == 0 else pltpu.roll(xw, s, axis=1)

    # Build the im2col slab in VMEM scratch: two taps per aligned 8-sublane
    # store; host-precomputed masks zero out-of-bounds / wrapped / pad rows.
    n_pairs = (k3 + 1) // 2
    for pr in range(n_pairs):
        t0 = 2 * pr
        t1 = min(2 * pr + 1, k3 - 1)
        r0 = tap(t0)
        r1 = r0 if t1 == t0 else tap(t1)
        rows = pl.ds(pr * 2 * Cin, 2 * Cin)
        slab_ref[rows, :] = jnp.concatenate([r0, r1], axis=0) * mask_ref[rows, :]

    # Single MXU matmul for the whole batch: (Cout, KP) x (KP, N*DHW).
    conv = jnp.dot(w_ref[...], slab_ref[...],
                   preferred_element_type=jnp.float32)            # (Cout, total)

    # Fused BatchNorm (training semantics, biased batch variance, centered).
    # Cross-lane reductions routed through the (otherwise idle) MXU.
    ones = jnp.ones((total, 1), jnp.float32)
    mean = jnp.dot(conv, ones, preferred_element_type=jnp.float32) * inv_count
    cen = conv - mean
    var = jnp.dot(cen * cen, ones, preferred_element_type=jnp.float32) * inv_count
    scale = g_ref[...] * jax.lax.rsqrt(var + eps)                  # (Cout, 1)
    y = cen * scale + b_ref[...]                                   # (Cout, total)

    # Back to (N, Cout, DHW): static, 512-aligned lane slices.
    for n in range(N):
        out_ref[n] = y[:, n * DHW:(n + 1) * DHW].astype(out_ref.dtype)


def _make_tap_masks(N, D, H, W, Cin, k, KP):
    """Host-precomputed boundary masks, (KP, N*D*H*W) float32."""
    DHW = D * H * W
    p = (k - 1) // 2
    pos = np.arange(DHW)
    d = pos // (H * W)
    h = (pos // W) % H
    w = pos % W
    mask = np.zeros((KP, N * DHW), np.float32)
    t = 0
    for kd in range(k):
        for kh in range(k):
            for kw in range(k):
                dd, dh, dw = kd - p, kh - p, kw - p
                m = ((d + dd >= 0) & (d + dd < D) &
                     (h + dh >= 0) & (h + dh < H) &
                     (w + dw >= 0) & (w + dw < W)).astype(np.float32)
                mask[t * Cin:(t + 1) * Cin, :] = np.tile(m, N)[None, :]
                t += 1
    return mask   # rows >= k^3*Cin stay zero (slab / weight padding rows)


def cb_forward(x_ncdhw, w_dhwio, gamma, beta, *, k=3, eps=1e-3):
    """x: (N, Cin, D, H, W); w: (k, k, k, Cin, Cout); gamma/beta: (Cout,)."""
    N, Cin, D, H, W = x_ncdhw.shape
    Cout = w_dhwio.shape[-1]
    DHW = D * H * W
    k3 = k * k * k
    KP = 2 * Cin * ((k3 + 1) // 2)              # slab rows padded for paired stores

    x3 = x_ncdhw.reshape(N, Cin, DHW)                              # free reshape
    w2 = w_dhwio.reshape(k3 * Cin, Cout).T.astype(jnp.float32)     # (Cout, k3*Cin)
    w2 = jnp.pad(w2, ((0, 0), (0, KP - k3 * Cin)))                 # (Cout, KP)
    g2 = gamma.reshape(Cout, 1).astype(jnp.float32)
    b2 = beta.reshape(Cout, 1).astype(jnp.float32)
    masks = jnp.asarray(_make_tap_masks(N, D, H, W, Cin, k, KP))

    kern = functools.partial(_cb_kernel, N=N, D=D, H=H, W=W, Cin=Cin, k=k,
                             eps=eps)

    out3 = pl.pallas_call(
        kern,
        out_shape=jax.ShapeDtypeStruct((N, Cout, DHW), jnp.float32),
        grid_spec=pltpu.PrefetchScalarGridSpec(
            num_scalar_prefetch=0,
            grid=(1,),
            in_specs=[
                pl.BlockSpec((N, Cin, DHW), lambda i: (0, 0, 0)),
                pl.BlockSpec((Cout, KP), lambda i: (0, 0)),
                pl.BlockSpec((KP, N * DHW), lambda i: (0, 0)),
                pl.BlockSpec((Cout, 1), lambda i: (0, 0)),
                pl.BlockSpec((Cout, 1), lambda i: (0, 0)),
            ],
            out_specs=pl.BlockSpec((N, Cout, DHW), lambda i: (0, 0, 0)),
            scratch_shapes=[pltpu.VMEM((KP, N * DHW), jnp.float32)],
        ),
        compiler_params=pltpu.CompilerParams(
            dimension_semantics=("arbitrary",)),
    )(x3, w2, masks, g2, b2)

    return out3.reshape(N, Cout, D, H, W)


# ----------------------------------------------------------------------------
# Pure-JAX reference (PyTorch semantics) for correctness checking
# ----------------------------------------------------------------------------
def _ref_forward(x_ncdhw, w_dhwio, gamma, beta, *, eps=1e-3):
    k = w_dhwio.shape[0]
    pad = (k - 1) // 2
    w_oidhw = jnp.transpose(w_dhwio, (4, 3, 0, 1, 2))
    y = jax.lax.conv_general_dilated(
        x_ncdhw, w_oidhw, window_strides=(1, 1, 1),
        padding=((pad, pad),) * 3,
        dimension_numbers=("NCDHW", "OIDHW", "NCDHW"))
    mean = jnp.mean(y, axis=(0, 2, 3, 4), keepdims=True)
    var = jnp.mean(jnp.square(y - mean), axis=(0, 2, 3, 4), keepdims=True)
    g = gamma.reshape(1, -1, 1, 1, 1)
    b = beta.reshape(1, -1, 1, 1, 1)
    return (y - mean) / jnp.sqrt(var + eps) * g + b


if __name__ == "__main__":
    N, C_IN, C_OUT, D, H, W, K = 2, 4, 8, 8, 8, 8, 3

    key = jax.random.PRNGKey(0)
    kx, kw, kg, kb = jax.random.split(key, 4)

    fan_in = C_IN * K ** 3
    bound = 1.0 / float(fan_in) ** 0.5
    w = jax.random.uniform(kw, (K, K, K, C_IN, C_OUT), jnp.float32, -bound, bound)
    gamma = jax.random.uniform(kg, (C_OUT,), jnp.float32, 0.5, 1.5)
    beta = 0.1 * jax.random.normal(kb, (C_OUT,), jnp.float32)
    x = jax.random.normal(kx, (N, C_IN, D, H, W), jnp.float32)   # NCDHW like PyTorch

    out = cb_forward(x, w, gamma, beta, k=K, eps=1e-3)
    out = jax.block_until_ready(out)

    ref = _ref_forward(x, w, gamma, beta, eps=1e-3)
    assert out.shape == (N, C_OUT, D, H, W), out.shape
    max_err = float(jnp.max(jnp.abs(out - ref)))
    assert jnp.allclose(out, ref, rtol=2e-4, atol=2e-4), max_err

    print("KERNEL_OK")
</pallas_src>

<mosaic_0001>
module attributes {stable_mosaic.version = 11 : i64} {
  func.func @_cb_kernel(%arg0: i32, %arg1: memref<2x4x512xf32, #tpu.memory_space<vmem>>, %arg2: memref<8x112xf32, #tpu.memory_space<vmem>>, %arg3: memref<112x1024xf32, #tpu.memory_space<vmem>>, %arg4: memref<8x1xf32, #tpu.memory_space<vmem>>, %arg5: memref<8x1xf32, #tpu.memory_space<vmem>>, %arg6: memref<2x8x512xf32, #tpu.memory_space<vmem>>, %arg7: memref<112x1024xf32, #tpu.memory_space<vmem>>) attributes {dimension_semantics = [#tpu.dimension_semantics<arbitrary>], iteration_bounds = array<i64: 1>, scalar_prefetch = 0 : i64, scratch_operands = 1 : i64, tpu.core_type = #tpu.core_type<tc>, window_params = [{pipeline_mode = #tpu.pipeline_mode<synchronous>, transform_indices = @transform_0, window_bounds = array<i64: 2, 4, 512>}, {pipeline_mode = #tpu.pipeline_mode<synchronous>, transform_indices = @transform_1, window_bounds = array<i64: 8, 112>}, {pipeline_mode = #tpu.pipeline_mode<synchronous>, transform_indices = @transform_2, window_bounds = array<i64: 112, 1024>}, {pipeline_mode = #tpu.pipeline_mode<synchronous>, transform_indices = @transform_3, window_bounds = array<i64: 8, 1>}, {pipeline_mode = #tpu.pipeline_mode<synchronous>, transform_indices = @transform_4, window_bounds = array<i64: 8, 1>}, {pipeline_mode = #tpu.pipeline_mode<synchronous>, transform_indices = @transform_5, window_bounds = array<i64: 2, 8, 512>}]} {
    %c0 = arith.constant 0 : index
    %c0_0 = arith.constant 0 : index
    %c0_1 = arith.constant 0 : index
    %0 = vector.load %arg1[%c0, %c0_0, %c0_1] : memref<2x4x512xf32, #tpu.memory_space<vmem>>, vector<1x4x512xf32>
    %1 = vector.shape_cast %0 : vector<1x4x512xf32> to vector<4x512xf32>
    %c1 = arith.constant 1 : index
    %c0_2 = arith.constant 0 : index
    %c0_3 = arith.constant 0 : index
    %2 = vector.load %arg1[%c1, %c0_2, %c0_3] : memref<2x4x512xf32, #tpu.memory_space<vmem>>, vector<1x4x512xf32>
    %3 = vector.shape_cast %2 : vector<1x4x512xf32> to vector<4x512xf32>
    %4 = tpu.concatenate %1, %3 in 1 : vector<4x512xf32>, vector<4x512xf32> -> vector<4x1024xf32>
    %c73_i32 = arith.constant 73 : i32
    %5 = tpu.dynamic_rotate %4 by %c73_i32 dim 1 : vector<4x1024xf32>, i32 -> vector<4x1024xf32>
    %c72_i32 = arith.constant 72 : i32
    %6 = tpu.dynamic_rotate %4 by %c72_i32 dim 1 : vector<4x1024xf32>, i32 -> vector<4x1024xf32>
    %7 = tpu.concatenate %5, %6 in 0 : vector<4x1024xf32>, vector<4x1024xf32> -> vector<8x1024xf32>
    %c0_4 = arith.constant 0 : index
    %c0_5 = arith.constant 0 : index
    %8 = vector.load %arg3[%c0_4, %c0_5] : memref<112x1024xf32, #tpu.memory_space<vmem>>, vector<8x1024xf32>
    %9 = arith.mulf %7, %8 : vector<8x1024xf32>
    %c0_6 = arith.constant 0 : index
    %c0_7 = arith.constant 0 : index
    %10 = vector.load %arg7[%c0_6, %c0_7] : memref<112x1024xf32, #tpu.memory_space<vmem>>, vector<8x1024xf32>
    tpu.vector_store %arg7[%c0_6, %c0_7], %9 {strides = array<i32>} : memref<112x1024xf32, #tpu.memory_space<vmem>>, vector<8x1024xf32>,
    %c71_i32 = arith.constant 71 : i32
    %11 = tpu.dynamic_rotate %4 by %c71_i32 dim 1 : vector<4x1024xf32>, i32 -> vector<4x1024xf32>
    %c65_i32 = arith.constant 65 : i32
    %12 = tpu.dynamic_rotate %4 by %c65_i32 dim 1 : vector<4x1024xf32>, i32 -> vector<4x1024xf32>
    %13 = tpu.concatenate %11, %12 in 0 : vector<4x1024xf32>, vector<4x1024xf32> -> vector<8x1024xf32>
    %c8 = arith.constant 8 : index
    %c0_8 = arith.constant 0 : index
    %14 = vector.load %arg3[%c8, %c0_8] : memref<112x1024xf32, #tpu.memory_space<vmem>>, vector<8x1024xf32>
    %15 = arith.mulf %13, %14 : vector<8x1024xf32>
    %c8_9 = arith.constant 8 : index
    %c0_10 = arith.constant 0 : index
    %16 = vector.load %arg7[%c8_9, %c0_10] : memref<112x1024xf32, #tpu.memory_space<vmem>>, vector<8x1024xf32>
    tpu.vector_store %arg7[%c8_9, %c0_10], %15 {strides = array<i32>} : memref<112x1024xf32, #tpu.memory_space<vmem>>, vector<8x1024xf32>,
    %c64_i32 = arith.constant 64 : i32
    %17 = tpu.dynamic_rotate %4 by %c64_i32 dim 1 : vector<4x1024xf32>, i32 -> vector<4x1024xf32>
    %c63_i32 = arith.constant 63 : i32
    %18 = tpu.dynamic_rotate %4 by %c63_i32 dim 1 : vector<4x1024xf32>, i32 -> vector<4x1024xf32>
    %19 = tpu.concatenate %17, %18 in 0 : vector<4x1024xf32>, vector<4x1024xf32> -> vector<8x1024xf32>
    %c16 = arith.constant 16 : index
    %c0_11 = arith.constant 0 : index
    %20 = vector.load %arg3[%c16, %c0_11] : memref<112x1024xf32, #tpu.memory_space<vmem>>, vector<8x1024xf32>
    %21 = arith.mulf %19, %20 : vector<8x1024xf32>
    %c16_12 = arith.constant 16 : index
    %c0_13 = arith.constant 0 : index
    %22 = vector.load %arg7[%c16_12, %c0_13] : memref<112x1024xf32, #tpu.memory_space<vmem>>, vector<8x1024xf32>
    tpu.vector_store %arg7[%c16_12, %c0_13], %21 {strides = array<i32>} : memref<112x1024xf32, #tpu.memory_space<vmem>>, vector<8x1024xf32>,
    %c57_i32 = arith.constant 57 : i32
    %23 = tpu.dynamic_rotate %4 by %c57_i32 dim 1 : vector<4x1024xf32>, i32 -> vector<4x1024xf32>
    %c56_i32 = arith.constant 56 : i32
    %24 = tpu.dynamic_rotate %4 by %c56_i32 dim 1 : vector<4x1024xf32>, i32 -> vector<4x1024xf32>
    %25 = tpu.concatenate %23, %24 in 0 : vector<4x1024xf32>, vector<4x1024xf32> -> vector<8x1024xf32>
    %c24 = arith.constant 24 : index
    %c0_14 = arith.constant 0 : index
    %26 = vector.load %arg3[%c24, %c0_14] : memref<112x1024xf32, #tpu.memory_space<vmem>>, vector<8x1024xf32>
    %27 = arith.mulf %25, %26 : vector<8x1024xf32>
    %c24_15 = arith.constant 24 : index
    %c0_16 = arith.constant 0 : index
    %28 = vector.load %arg7[%c24_15, %c0_16] : memref<112x1024xf32, #tpu.memory_space<vmem>>, vector<8x1024xf32>
    tpu.vector_store %arg7[%c24_15, %c0_16], %27 {strides = array<i32>} : memref<112x1024xf32, #tpu.memory_space<vmem>>, vector<8x1024xf32>,
    %c55_i32 = arith.constant 55 : i32
    %29 = tpu.dynamic_rotate %4 by %c55_i32 dim 1 : vector<4x1024xf32>, i32 -> vector<4x1024xf32>
    %c9_i32 = arith.constant 9 : i32
    %30 = tpu.dynamic_rotate %4 by %c9_i32 dim 1 : vector<4x1024xf32>, i32 -> vector<4x1024xf32>
    %31 = tpu.concatenate %29, %30 in 0 : vector<4x1024xf32>, vector<4x1024xf32> -> vector<8x1024xf32>
    %c32 = arith.constant 32 : index
    %c0_17 = arith.constant 0 : index
    %32 = vector.load %arg3[%c32, %c0_17] : memref<112x1024xf32, #tpu.memory_space<vmem>>, vector<8x1024xf32>
    %33 = arith.mulf %31, %32 : vector<8x1024xf32>
    %c32_18 = arith.constant 32 : index
    %c0_19 = arith.constant 0 : index
    %34 = vector.load %arg7[%c32_18, %c0_19] : memref<112x1024xf32, #tpu.memory_space<vmem>>, vector<8x1024xf32>
    tpu.vector_store %arg7[%c32_18, %c0_19], %33 {strides = array<i32>} : memref<112x1024xf32, #tpu.memory_space<vmem>>, vector<8x1024xf32>,
    %c8_i32 = arith.constant 8 : i32
    %35 = tpu.dynamic_rotate %4 by %c8_i32 dim 1 : vector<4x1024xf32>, i32 -> vector<4x1024xf32>
    %c7_i32 = arith.constant 7 : i32
    %36 = tpu.dynamic_rotate %4 by %c7_i32 dim 1 : vector<4x1024xf32>, i32 -> vector<4x1024xf32>
    %37 = tpu.concatenate %35, %36 in 0 : vector<4x1024xf32>, vector<4x1024xf32> -> vector<8x1024xf32>
    %c40 = arith.constant 40 : index
    %c0_20 = arith.constant 0 : index
    %38 = vector.load %arg3[%c40, %c0_20] : memref<112x1024xf32, #tpu.memory_space<vmem>>, vector<8x1024xf32>
    %39 = arith.mulf %37, %38 : vector<8x1024xf32>
    %c40_21 = arith.constant 40 : index
    %c0_22 = arith.constant 0 : index
    %40 = vector.load %arg7[%c40_21, %c0_22] : memref<112x1024xf32, #tpu.memory_space<vmem>>, vector<8x1024xf32>
    tpu.vector_store %arg7[%c40_21, %c0_22], %39 {strides = array<i32>} : memref<112x1024xf32, #tpu.memory_space<vmem>>, vector<8x1024xf32>,
    %c1_i32 = arith.constant 1 : i32
    %41 = tpu.dynamic_rotate %4 by %c1_i32 dim 1 : vector<4x1024xf32>, i32 -> vector<4x1024xf32>
    %42 = tpu.concatenate %41, %4 in 0 : vector<4x1024xf32>, vector<4x1024xf32> -> vector<8x1024xf32>
    %c48 = arith.constant 48 : index
    %c0_23 = arith.constant 0 : index
    %43 = vector.load %arg3[%c48, %c0_23] : memref<112x1024xf32, #tpu.memory_space<vmem>>, vector<8x1024xf32>
    %44 = arith.mulf %42, %43 : vector<8x1024xf32>
    %c48_24 = arith.constant 48 : index
    %c0_25 = arith.constant 0 : index
    %45 = vector.load %arg7[%c48_24, %c0_25] : memref<112x1024xf32, #tpu.memory_space<vmem>>, vector<8x1024xf32>
    tpu.vector_store %arg7[%c48_24, %c0_25], %44 {strides = array<i32>} : memref<112x1024xf32, #tpu.memory_space<vmem>>, vector<8x1024xf32>,
    %c1023_i32 = arith.constant 1023 : i32
    %46 = tpu.dynamic_rotate %4 by %c1023_i32 dim 1 : vector<4x1024xf32>, i32 -> vector<4x1024xf32>
    %c1017_i32 = arith.constant 1017 : i32
    %47 = tpu.dynamic_rotate %4 by %c1017_i32 dim 1 : vector<4x1024xf32>, i32 -> vector<4x1024xf32>
    %48 = tpu.concatenate %46, %47 in 0 : vector<4x1024xf32>, vector<4x1024xf32> -> vector<8x1024xf32>
    %c56 = arith.constant 56 : index
    %c0_26 = arith.constant 0 : index
    %49 = vector.load %arg3[%c56, %c0_26] : memref<112x1024xf32, #tpu.memory_space<vmem>>, vector<8x1024xf32>
    %50 = arith.mulf %48, %49 : vector<8x1024xf32>
    %c56_27 = arith.constant 56 : index
    %c0_28 = arith.constant 0 : index
    %51 = vector.load %arg7[%c56_27, %c0_28] : memref<112x1024xf32, #tpu.memory_space<vmem>>, vector<8x1024xf32>
    tpu.vector_store %arg7[%c56_27, %c0_28], %50 {strides = array<i32>} : memref<112x1024xf32, #tpu.memory_space<vmem>>, vector<8x1024xf32>,
    %c1016_i32 = arith.constant 1016 : i32
    %52 = tpu.dynamic_rotate %4 by %c1016_i32 dim 1 : vector<4x1024xf32>, i32 -> vector<4x1024xf32>
    %c1015_i32 = arith.constant 1015 : i32
    %53 = tpu.dynamic_rotate %4 by %c1015_i32 dim 1 : vector<4x1024xf32>, i32 -> vector<4x1024xf32>
    %54 = tpu.concatenate %52, %53 in 0 : vector<4x1024xf32>, vector<4x1024xf32> -> vector<8x1024xf32>
    %c64 = arith.constant 64 : index
    %c0_29 = arith.constant 0 : index
    %55 = vector.load %arg3[%c64, %c0_29] : memref<112x1024xf32, #tpu.memory_space<vmem>>, vector<8x1024xf32>
    %56 = arith.mulf %54, %55 : vector<8x1024xf32>
    %c64_30 = arith.constant 64 : index
    %c0_31 = arith.constant 0 : index
    %57 = vector.load %arg7[%c64_30, %c0_31] : memref<112x1024xf32, #tpu.memory_space<vmem>>, vector<8x1024xf32>
    tpu.vector_store %arg7[%c64_30, %c0_31], %56 {strides = array<i32>} : memref<112x1024xf32, #tpu.memory_space<vmem>>, vector<8x1024xf32>,
    %c969_i32 = arith.constant 969 : i32
    %58 = tpu.dynamic_rotate %4 by %c969_i32 dim 1 : vector<4x1024xf32>, i32 -> vector<4x1024xf32>
    %c968_i32 = arith.constant 968 : i32
    %59 = tpu.dynamic_rotate %4 by %c968_i32 dim 1 : vector<4x1024xf32>, i32 -> vector<4x1024xf32>
    %60 = tpu.concatenate %58, %59 in 0 : vector<4x1024xf32>, vector<4x1024xf32> -> vector<8x1024xf32>
    %c72 = arith.constant 72 : index
    %c0_32 = arith.constant 0 : index
    %61 = vector.load %arg3[%c72, %c0_32] : memref<112x1024xf32, #tpu.memory_space<vmem>>, vector<8x1024xf32>
    %62 = arith.mulf %60, %61 : vector<8x1024xf32>
    %c72_33 = arith.constant 72 : index
    %c0_34 = arith.constant 0 : index
    %63 = vector.load %arg7[%c72_33, %c0_34] : memref<112x1024xf32, #tpu.memory_space<vmem>>, vector<8x1024xf32>
    tpu.vector_store %arg7[%c72_33, %c0_34], %62 {strides = array<i32>} : memref<112x1024xf32, #tpu.memory_space<vmem>>, vector<8x1024xf32>,
    %c967_i32 = arith.constant 967 : i32
    %64 = tpu.dynamic_rotate %4 by %c967_i32 dim 1 : vector<4x1024xf32>, i32 -> vector<4x1024xf32>
    %c961_i32 = arith.constant 961 : i32
    %65 = tpu.dynamic_rotate %4 by %c961_i32 dim 1 : vector<4x1024xf32>, i32 -> vector<4x1024xf32>
    %66 = tpu.concatenate %64, %65 in 0 : vector<4x1024xf32>, vector<4x1024xf32> -> vector<8x1024xf32>
    %c80 = arith.constant 80 : index
    %c0_35 = arith.constant 0 : index
    %67 = vector.load %arg3[%c80, %c0_35] : memref<112x1024xf32, #tpu.memory_space<vmem>>, vector<8x1024xf32>
    %68 = arith.mulf %66, %67 : vector<8x1024xf32>
    %c80_36 = arith.constant 80 : index
    %c0_37 = arith.constant 0 : index
    %69 = vector.load %arg7[%c80_36, %c0_37] : memref<112x1024xf32, #tpu.memory_space<vmem>>, vector<8x1024xf32>
    tpu.vector_store %arg7[%c80_36, %c0_37], %68 {strides = array<i32>} : memref<112x1024xf32, #tpu.memory_space<vmem>>, vector<8x1024xf32>,
    %c960_i32 = arith.constant 960 : i32
    %70 = tpu.dynamic_rotate %4 by %c960_i32 dim 1 : vector<4x1024xf32>, i32 -> vector<4x1024xf32>
    %c959_i32 = arith.constant 959 : i32
    %71 = tpu.dynamic_rotate %4 by %c959_i32 dim 1 : vector<4x1024xf32>, i32 -> vector<4x1024xf32>
    %72 = tpu.concatenate %70, %71 in 0 : vector<4x1024xf32>, vector<4x1024xf32> -> vector<8x1024xf32>
    %c88 = arith.constant 88 : index
    %c0_38 = arith.constant 0 : index
    %73 = vector.load %arg3[%c88, %c0_38] : memref<112x1024xf32, #tpu.memory_space<vmem>>, vector<8x1024xf32>
    %74 = arith.mulf %72, %73 : vector<8x1024xf32>
    %c88_39 = arith.constant 88 : index
    %c0_40 = arith.constant 0 : index
    %75 = vector.load %arg7[%c88_39, %c0_40] : memref<112x1024xf32, #tpu.memory_space<vmem>>, vector<8x1024xf32>
    tpu.vector_store %arg7[%c88_39, %c0_40], %74 {strides = array<i32>} : memref<112x1024xf32, #tpu.memory_space<vmem>>, vector<8x1024xf32>,
    %c953_i32 = arith.constant 953 : i32
    %76 = tpu.dynamic_rotate %4 by %c953_i32 dim 1 : vector<4x1024xf32>, i32 -> vector<4x1024xf32>
    %c952_i32 = arith.constant 952 : i32
    %77 = tpu.dynamic_rotate %4 by %c952_i32 dim 1 : vector<4x1024xf32>, i32 -> vector<4x1024xf32>
    %78 = tpu.concatenate %76, %77 in 0 : vector<4x1024xf32>, vector<4x1024xf32> -> vector<8x1024xf32>
    %c96 = arith.constant 96 : index
    %c0_41 = arith.constant 0 : index
    %79 = vector.load %arg3[%c96, %c0_41] : memref<112x1024xf32, #tpu.memory_space<vmem>>, vector<8x1024xf32>
    %80 = arith.mulf %78, %79 : vector<8x1024xf32>
    %c96_42 = arith.constant 96 : index
    %c0_43 = arith.constant 0 : index
    %81 = vector.load %arg7[%c96_42, %c0_43] : memref<112x1024xf32, #tpu.memory_space<vmem>>, vector<8x1024xf32>
    tpu.vector_store %arg7[%c96_42, %c0_43], %80 {strides = array<i32>} : memref<112x1024xf32, #tpu.memory_space<vmem>>, vector<8x1024xf32>,
    %c951_i32 = arith.constant 951 : i32
    %82 = tpu.dynamic_rotate %4 by %c951_i32 dim 1 : vector<4x1024xf32>, i32 -> vector<4x1024xf32>
    %83 = tpu.concatenate %82, %82 in 0 : vector<4x1024xf32>, vector<4x1024xf32> -> vector<8x1024xf32>
    %c104 = arith.constant 104 : index
    %c0_44 = arith.constant 0 : index
    %84 = vector.load %arg3[%c104, %c0_44] : memref<112x1024xf32, #tpu.memory_space<vmem>>, vector<8x1024xf32>
    %85 = arith.mulf %83, %84 : vector<8x1024xf32>
    %c104_45 = arith.constant 104 : index
    %c0_46 = arith.constant 0 : index
    %86 = vector.load %arg7[%c104_45, %c0_46] : memref<112x1024xf32, #tpu.memory_space<vmem>>, vector<8x1024xf32>
    tpu.vector_store %arg7[%c104_45, %c0_46], %85 {strides = array<i32>} : memref<112x1024xf32, #tpu.memory_space<vmem>>, vector<8x1024xf32>,
    %c0_47 = arith.constant 0 : index
    %c0_48 = arith.constant 0 : index
    %87 = vector.load %arg2[%c0_47, %c0_48] : memref<8x112xf32, #tpu.memory_space<vmem>>, vector<8x112xf32>
    %c0_49 = arith.constant 0 : index
    %c0_50 = arith.constant 0 : index
    %88 = vector.load %arg7[%c0_49, %c0_50] : memref<112x1024xf32, #tpu.memory_space<vmem>>, vector<112x1024xf32>
    %cst = arith.constant dense<0.000000e+00> : vector<8x1024xf32>
    %89 = tpu.matmul %87, %88, %cst {dimension_numbers = #tpu.dot_dimension_numbers<[1], [0], [0], [1], [0, 0, 1, 1], [], []>} : vector<8x112xf32>, vector<112x1024xf32>, vector<8x1024xf32> -> vector<8x1024xf32>
    %cst_51 = arith.constant 1.000000e+00 : f32
    %90 = vector.broadcast %cst_51 : f32 to vector<1024x1xf32>
    %cst_52 = arith.constant dense<0.000000e+00> : vector<8x1xf32>
    %91 = tpu.matmul %89, %90, %cst_52 {dimension_numbers = #tpu.dot_dimension_numbers<[1], [0], [0], [1], [0, 0, 1, 1], [], []>} : vector<8x1024xf32>, vector<1024x1xf32>, vector<8x1xf32> -> vector<8x1xf32>
    %cst_53 = arith.constant 9.765625E-4 : f32
    %92 = vector.broadcast %cst_53 : f32 to vector<8x1xf32>
    %93 = arith.mulf %91, %92 : vector<8x1xf32>
    %94 = vector.broadcast %93 : vector<8x1xf32> to vector<8x1024xf32>
    %95 = arith.subf %89, %94 : vector<8x1024xf32>
    %96 = arith.mulf %95, %95 : vector<8x1024xf32>
    %cst_54 = arith.constant dense<0.000000e+00> : vector<8x1xf32>
    %97 = tpu.matmul %96, %90, %cst_54 {dimension_numbers = #tpu.dot_dimension_numbers<[1], [0], [0], [1], [0, 0, 1, 1], [], []>} : vector<8x1024xf32>, vector<1024x1xf32>, vector<8x1xf32> -> vector<8x1xf32>
    %cst_55 = arith.constant 9.765625E-4 : f32
    %98 = vector.broadcast %cst_55 : f32 to vector<8x1xf32>
    %99 = arith.mulf %97, %98 : vector<8x1xf32>
    %c0_56 = arith.constant 0 : index
    %c0_57 = arith.constant 0 : index
    %100 = vector.load %arg4[%c0_56, %c0_57] : memref<8x1xf32, #tpu.memory_space<vmem>>, vector<8x1xf32>
    %cst_58 = arith.constant 1.000000e-03 : f32
    %101 = vector.broadcast %cst_58 : f32 to vector<8x1xf32>
    %102 = arith.addf %99, %101 : vector<8x1xf32>
    %103 = math.rsqrt %102 : vector<8x1xf32>
    %104 = arith.mulf %100, %103 : vector<8x1xf32>
    %105 = vector.broadcast %104 : vector<8x1xf32> to vector<8x1024xf32>
    %106 = arith.mulf %95, %105 : vector<8x1024xf32>
    %c0_59 = arith.constant 0 : index
    %c0_60 = arith.constant 0 : index
    %107 = vector.load %arg5[%c0_59, %c0_60] : memref<8x1xf32, #tpu.memory_space<vmem>>, vector<8x1xf32>
    %108 = vector.broadcast %107 : vector<8x1xf32> to vector<8x1024xf32>
    %109 = arith.addf %106, %108 : vector<8x1024xf32>
    %110 = vector.extract_strided_slice %109 {offsets = [0, 0], sizes = [8, 512], strides = [1, 1]} : vector<8x1024xf32> to vector<8x512xf32>
    %c0_61 = arith.constant 0 : index
    %c0_62 = arith.constant 0 : index
    %c0_63 = arith.constant 0 : index
    %111 = vector.load %arg6[%c0_61, %c0_62, %c0_63] : memref<2x8x512xf32, #tpu.memory_space<vmem>>, vector<1x8x512xf32>
    %112 = vector.shape_cast %111 : vector<1x8x512xf32> to vector<8x512xf32>
    %113 = vector.shape_cast %110 : vector<8x512xf32> to vector<1x8x512xf32>
    tpu.vector_store %arg6[%c0_61, %c0_62, %c0_63], %113 {strides = array<i32>} : memref<2x8x512xf32, #tpu.memory_space<vmem>>, vector<1x8x512xf32>,
    %114 = vector.extract_strided_slice %109 {offsets = [0, 512], sizes = [8, 512], strides = [1, 1]} : vector<8x1024xf32> to vector<8x512xf32>
    %c1_64 = arith.constant 1 : index
    %c0_65 = arith.constant 0 : index
    %c0_66 = arith.constant 0 : index
    %115 = vector.load %arg6[%c1_64, %c0_65, %c0_66] : memref<2x8x512xf32, #tpu.memory_space<vmem>>, vector<1x8x512xf32>
    %116 = vector.shape_cast %115 : vector<1x8x512xf32> to vector<8x512xf32>
    %117 = vector.shape_cast %114 : vector<8x512xf32> to vector<1x8x512xf32>
    tpu.vector_store %arg6[%c1_64, %c0_65, %c0_66], %117 {strides = array<i32>} : memref<2x8x512xf32, #tpu.memory_space<vmem>>, vector<1x8x512xf32>,
    return
  }
  func.func @transform_0(%arg0: i32) -> (i32, i32, i32) {
    %c0_i32 = arith.constant 0 : i32
    %c0_i32_0 = arith.constant 0 : i32
    %c0_i32_1 = arith.constant 0 : i32
    %c0_i32_2 = arith.constant 0 : i32
    return %c0_i32, %c0_i32_0, %c0_i32_1 : i32, i32, i32
  }
  func.func @transform_1(%arg0: i32) -> (i32, i32) {
    %c0_i32 = arith.constant 0 : i32
    %c0_i32_0 = arith.constant 0 : i32
    %c0_i32_1 = arith.constant 0 : i32
    return %c0_i32, %c0_i32_0 : i32, i32
  }
  func.func @transform_2(%arg0: i32) -> (i32, i32) {
    %c0_i32 = arith.constant 0 : i32
    %c0_i32_0 = arith.constant 0 : i32
    %c0_i32_1 = arith.constant 0 : i32
    return %c0_i32, %c0_i32_0 : i32, i32
  }
  func.func @transform_3(%arg0: i32) -> (i32, i32) {
    %c0_i32 = arith.constant 0 : i32
    %c0_i32_0 = arith.constant 0 : i32
    %c0_i32_1 = arith.constant 0 : i32
    return %c0_i32, %c0_i32_0 : i32, i32
  }
  func.func @transform_4(%arg0: i32) -> (i32, i32) {
    %c0_i32 = arith.constant 0 : i32
    %c0_i32_0 = arith.constant 0 : i32
    %c0_i32_1 = arith.constant 0 : i32
    return %c0_i32, %c0_i32_0 : i32, i32
  }
  func.func @transform_5(%arg0: i32) -> (i32, i32, i32) {
    %c0_i32 = arith.constant 0 : i32
    %c0_i32_0 = arith.constant 0 : i32
    %c0_i32_1 = arith.constant 0 : i32
    %c0_i32_2 = arith.constant 0 : i32
    return %c0_i32, %c0_i32_0, %c0_i32_1 : i32, i32, i32
  }
}

</mosaic_0001>

<bundles_post_ra>
// kernel: tpu_custom_call.1
= control target key start
LH: loop header
LB: loop body
LE: loop exit
PB: predicated region body
PF: predicated region fallthrough
CT: control target
= control target key end

     0   :  { %10 = vsyncpa [#allocation4], 0  ;;  %s4195_s0 = inlined_call_operand.hbm [shape: f32[2,4,512], index: 0, kind: input, shape index: {}]   ;;  %s4196_s1 = inlined_call_operand.vmem [shape: f32[8,112], index: 1, kind: input, shape index: {}]   ;;  %s4197_s2 = inlined_call_operand.hbm [shape: f32[112,1024], index: 2, kind: input, shape index: {}]   ;;  %s4198_s3 = inlined_call_operand.vmem [shape: f32[8,1], index: 3, kind: input, shape index: {}]   ;;  %s4199_s4 = inlined_call_operand.vmem [shape: f32[8,1], index: 4, kind: input, shape index: {}]   ;;  %s4200_s5 = inlined_call_operand.hbm [shape: f32[2,8,512], index: 5, kind: output, shape index: {}]  }
   0x1   :  { %11 = vsyncpa [#allocation7], 0 }
   0x2   :  { %12 = vsyncpa [#allocation5], 0  ;;  %s2818_s18 = smov [#allocation3]   ;;  %s2746_s22 = scalar_lea.hbm %s4195_s0, 512 }
   0x3   :  { %s18_s19 = sshll.u32 %s2818_s18, 4  ;;  %p2747_p0 = scmp.ne.s32.totalorder %s4195_s0, %s2746_s22  ;;  %s19_s19 = int_to_ptr.vmem [resolvable:$true] %s18_s19 }
   0x4   :  { %p2750_p1 = scmp.lt.u32.totalorder %s2746_s22, %s4195_s0 }
   0x6   :  { %p2752_p2 = pnand %p2750_p1, %p2747_p0 }
   0x8   :  { %2755 = shalt.err (!%p2752_p2)
}
   0x9   :  { %s2756_s27 = scalar_lea.vmem %s19_s19, 512  ;;  %p2761_p4 = scmp.lt.s32.totalorder %s19_s19, %s19_s19 }
   0xa   :  { %p2757_p3 = scmp.ne.s32.totalorder %s19_s19, %s2756_s27  ;;  %p2762_p5 = scmp.lt.s32.totalorder %s2756_s27, %s2756_s27 }
   0xc   :  { %p2763_p6 = por %p2762_p5, %p2761_p4 }
   0xe   :  { %p2764_p7 = pnand %p2763_p6, %p2757_p3 }
  0x10   :  { %2767 = shalt.err (!%p2764_p7)
}
  0x11   :  { %s2819_s28 = smov 256   ;;  %s2820_s29 = smov 16  }
  0x12   :  { %24 = dma.hbm_to_vmem [thread:$0]  %s4195_s0, 512, %s19_s19, [#allocation4], %s2819_s28, %s2819_s28, %s2820_s29  }
  0x13   :  { %s2821_s7 = smov [#allocation6]   ;;  %s2768_s11 = scalar_lea.hbm %s4197_s2, 14336 }
  0x14   :  { %s32_s8 = sshll.u32 %s2821_s7, 4  ;;  %p2769_p8 = scmp.ne.s32.totalorder %s4197_s2, %s2768_s11  ;;  %s33_s8 = int_to_ptr.vmem [resolvable:$true] %s32_s8 }
  0x15   :  { %p2772_p9 = scmp.lt.u32.totalorder %s2768_s11, %s4197_s2 }
  0x17   :  { %p2774_p10 = pnand %p2772_p9, %p2769_p8 }
  0x19   :  { %2777 = shalt.err (!%p2774_p10)
}
  0x1a   :  { %s2778_s16 = scalar_lea.vmem %s33_s8, 14336  ;;  %p2783_p12 = scmp.lt.s32.totalorder %s33_s8, %s33_s8 }
  0x1b   :  { %p2779_p11 = scmp.ne.s32.totalorder %s33_s8, %s2778_s16  ;;  %p2784_p13 = scmp.lt.s32.totalorder %s2778_s16, %s2778_s16 }
  0x1d   :  { %p2785_p0 = por %p2784_p13, %p2783_p12 }
  0x1f   :  { %p2786_p1 = pnand %p2785_p0, %p2779_p11 }
  0x21   :  { %2789 = shalt.err (!%p2786_p1)
}
  0x22   :  { %s2822_s0 = smov 1024   ;;  %s2823_s17 = smov 64  }
  0x23   :  { %38 = dma.hbm_to_vmem [thread:$0]  %s4197_s2, 14336, %s33_s8, [#allocation7], %s2822_s0, %s2822_s0, %s2823_s17  }
  0x24   :  { %2812 = dma.done.wait [#allocation4], 512  }
  0x25   :  { %2813 = vsyncadd [#allocation4], 4294966784 }
  0x26   :  { %2814 = dma.done.wait [#allocation7], 14336  }
  0x27   :  { %2815 = vsyncadd [#allocation7], 4294952960  ;;  %v2901_v0 = vld [vmem:[#allocation3] sm:$0xff]  ;;  %s2824_s20 = smov 65   ;;  %s2825_s21 = smov 72   ;;  %v2911_v2 = vld [vmem:[#allocation3 + $0x18] sm:$0xff]  ;;  %v82_v8 = vlaneseq }
  0x28   :  { %200 = vrot.lane.b32.xlu1 %v2901_v0, %s2824_s20  ;;  %93 = vrot.lane.b32.xlu0 %v2901_v0, %s2825_s21  ;;  %v2909_v1 = vcombine.high %v2901_v0, %v2901_v0  ;;  %v2919_v3 = vcombine.high %v2911_v2, %v2911_v2  ;;  %v2925_v4 = vld [vmem:[#allocation3 + $0x8] sm:$0xff]  ;;  %s2826_s2 = smov 73   ;;  %s2827_s22 = smov 71   ;;  %vm142_vm3 = vcmask 1043456   ;;  %v3079_v22 = vld [vmem:[#allocation3 + $0x10] sm:$0xff]  ;;  %v151_v42 = vld [vmem:[#allocation6] sm:$0xff] }
  0x29   :  { %v2933_v5 = vcombine.high %v2925_v4, %v2925_v4  ;;  %s2828_s23 = smov 63   ;;  %s2829_s24 = smov 56   ;;  %v3047_v11 = vand.u32 127, %v82_v8  ;;  %v152_v27 = vld [vmem:[#allocation6 + $0x8] sm:$0xff]  ;;  %v257_v43 = vld [vmem:[#allocation6 + $0x40] sm:$0xff]  ;;  %v154_v61 = vld [vmem:[#allocation6 + $0x18] sm:$0xff] }
  0x2a   :  { %s2830_s25 = smov 57   ;;  %s2831_s26 = smov 9   ;;  %v258_v28 = vld [vmem:[#allocation6 + $0x48] sm:$0xff] }
  0x2b   :  { %s2832_s27 = smov 7   ;;  %s2833_s28 = smov 55   ;;  %vm109_vm0 = vcmp.lt.s32.totalorder %v3047_v11, 72  ;;  %vm216_vm1 = vcmp.lt.s32.totalorder %v3047_v11, 65  ;;  %vm84_vm2 = vcmp.lt.s32.totalorder %v3047_v11, 73  ;;  %vm191_vm4 = vcmp.lt.s32.totalorder %v3047_v11, 71 }
  0x2c   :  { %202 = vrot.lane.b32.xlu1 %v2909_v1, %s2824_s20  ;;  %95 = vrot.lane.b32.xlu0 %v2909_v1, %s2825_s21  ;;  %s2834_s29 = smov 8   ;;  %s2835_s30 = smov 121   ;;  %vm322_vm5 = vcmp.lt.s32.totalorder %v3047_v11, 63  ;;  %vm297_vm6 = vcmp.lt.s32.totalorder %v3047_v11, 64  ;;  %vm428_vm7 = vcmp.lt.s32.totalorder %v3047_v11, 56  ;;  %vm403_vm8 = vcmp.lt.s32.totalorder %v3047_v11, 57 }
  0x2d   :  { %s2836_s6 = smov 1   ;;  %s2837_s7 = smov 127   ;;  %vm509_vm9 = vcmp.lt.s32.totalorder %v3047_v11, 55  ;;  %vm534_vm10 = vcmp.lt.s32.totalorder %v3047_v11, 9  ;;  %vm640_vm11 = vcmp.lt.s32.totalorder %v3047_v11, 7  ;;  %vm615_vm12 = vcmp.lt.s32.totalorder %v3047_v11, 8 }
  0x2e   :  { %s2838_s8 = smov 119   ;;  %s2839_s9 = smov 120   ;;  %vm819_vm13 = vcmp.lt.s32.totalorder %v3047_v11, 121  ;;  %vm4213_vm14 = vcmp.lt.s32.totalorder %v3047_v11, 1  ;;  %vm4214_vm15 = vcmp.lt.s32.totalorder %v3047_v11, 127 }
  0x2f   :  { %s2843_s15 = smov [#allocation8]  }
  0x30   :  { %214 = vrot.lane.b32.xlu1 %v2919_v3, %s2824_s20  ;;  %107 = vrot.lane.b32.xlu0 %v2919_v3, %s2825_s21  ;;  %s2171_s16 = sshll.u32 %s2843_s15, 4  ;;  %s2172_s16 = int_to_ptr.vmem [resolvable:$true] %s2171_s16 }
  0x31   :  { %p2795_p3 = scmp.lt.s32.totalorder %s2172_s16, %s2172_s16 }
  0x34   :  { %68 = vrot.lane.b32.xlu1 %v2909_v1, %s2826_s2  ;;  %66 = vrot.lane.b32.xlu0 %v2901_v0, %s2826_s2 }
  0x38   :  { %99 = vrot.lane.b32.xlu1 %v2933_v5, %s2825_s21  ;;  %97 = vrot.lane.b32.xlu0 %v2925_v4, %s2825_s21 }
  0x3c   :  { %177 = vrot.lane.b32.xlu1 %v2909_v1, %s2827_s22  ;;  %175 = vrot.lane.b32.xlu0 %v2901_v0, %s2827_s22 }
  0x40   :  { %206 = vrot.lane.b32.xlu1 %v2933_v5, %s2824_s20  ;;  %204 = vrot.lane.b32.xlu0 %v2925_v4, %s2824_s20 }
  0x44   :  { %189 = vrot.lane.b32.xlu1 %v2919_v3, %s2827_s22  ;;  %80 = vrot.lane.b32.xlu0 %v2919_v3, %s2826_s2 }
  0x48   :  { %72 = vrot.lane.b32.xlu1 %v2933_v5, %s2826_s2  ;;  %70 = vrot.lane.b32.xlu0 %v2925_v4, %s2826_s2 }
  0x4c   :  { %181 = vrot.lane.b32.xlu1 %v2933_v5, %s2827_s22  ;;  %179 = vrot.lane.b32.xlu0 %v2925_v4, %s2827_s22 }
  0x50   :  { %308 = vrot.lane.b32.xlu1 %v2909_v1, %s2828_s23  ;;  %306 = vrot.lane.b32.xlu0 %v2901_v0, %s2828_s23 }
  0x54   :  { %414 = vrot.lane.b32.xlu1 %v2909_v1, %s2829_s24  ;;  %412 = vrot.lane.b32.xlu0 %v2901_v0, %s2829_s24 }
  0x58   :  { %426 = vrot.lane.b32.xlu1 %v2919_v3, %s2829_s24  ;;  %320 = vrot.lane.b32.xlu0 %v2919_v3, %s2828_s23 }
  0x5c   :  { %283 = vrot.lane.b32.xlu1 %v2909_v1, %s2823_s17  ;;  %281 = vrot.lane.b32.xlu0 %v2901_v0, %s2823_s17 }
  0x60   :  { %312 = vrot.lane.b32.xlu1 %v2933_v5, %s2828_s23  ;;  %310 = vrot.lane.b32.xlu0 %v2925_v4, %s2828_s23 }
  0x64   :  { %389 = vrot.lane.b32.xlu1 %v2909_v1, %s2830_s25  ;;  %387 = vrot.lane.b32.xlu0 %v2901_v0, %s2830_s25 }
  0x68   :  { %418 = vrot.lane.b32.xlu1 %v2933_v5, %s2829_s24  ;;  %416 = vrot.lane.b32.xlu0 %v2925_v4, %s2829_s24 }
  0x6c   :  { %401 = vrot.lane.b32.xlu1 %v2919_v3, %s2830_s25  ;;  %295 = vrot.lane.b32.xlu0 %v2919_v3, %s2823_s17 }
  0x70   :  { %287 = vrot.lane.b32.xlu1 %v2933_v5, %s2823_s17  ;;  %285 = vrot.lane.b32.xlu0 %v2925_v4, %s2823_s17 }
  0x74   :  { %393 = vrot.lane.b32.xlu1 %v2933_v5, %s2830_s25  ;;  %391 = vrot.lane.b32.xlu0 %v2925_v4, %s2830_s25 }
  0x78   :  { %520 = vrot.lane.b32.xlu1 %v2909_v1, %s2831_s26  ;;  %518 = vrot.lane.b32.xlu0 %v2901_v0, %s2831_s26 }
  0x7c   :  { %626 = vrot.lane.b32.xlu1 %v2909_v1, %s2832_s27  ;;  %624 = vrot.lane.b32.xlu0 %v2901_v0, %s2832_s27 }
  0x80   :  { %638 = vrot.lane.b32.xlu1 %v2919_v3, %s2832_s27  ;;  %532 = vrot.lane.b32.xlu0 %v2919_v3, %s2831_s26 }
  0x84   :  { %495 = vrot.lane.b32.xlu1 %v2909_v1, %s2833_s28  ;;  %493 = vrot.lane.b32.xlu0 %v2901_v0, %s2833_s28 }
  0x88   :  { %524 = vrot.lane.b32.xlu1 %v2933_v5, %s2831_s26  ;;  %522 = vrot.lane.b32.xlu0 %v2925_v4, %s2831_s26 }
  0x8c   :  { %601 = vrot.lane.b32.xlu1 %v2909_v1, %s2834_s29  ;;  %599 = vrot.lane.b32.xlu0 %v2901_v0, %s2834_s29 }
  0x90   :  { %630 = vrot.lane.b32.xlu1 %v2933_v5, %s2832_s27  ;;  %628 = vrot.lane.b32.xlu0 %v2925_v4, %s2832_s27 }
  0x94   :  { %613 = vrot.lane.b32.xlu1 %v2919_v3, %s2834_s29  ;;  %507 = vrot.lane.b32.xlu0 %v2919_v3, %s2833_s28 }
  0x98   :  { %499 = vrot.lane.b32.xlu1 %v2933_v5, %s2833_s28  ;;  %497 = vrot.lane.b32.xlu0 %v2925_v4, %s2833_s28 }
  0x9a   :  { %v201_v6 = vpop.permute.xlu1 %200  ;;  %v94_v7 = vpop.permute.xlu0 %93 }
  0x9c   :  { %605 = vrot.lane.b32.xlu1 %v2933_v5, %s2834_s29  ;;  %603 = vrot.lane.b32.xlu0 %v2925_v4, %s2834_s29 }
  0x9e   :  { %v3039_v9 = vpop.permute.xlu1 %202  ;;  %v3041_v10 = vpop.permute.xlu0 %95 }
  0x9f   :  { %v116_v16 = vsel %vm109_vm0, %v94_v7, %v3041_v10  ;;  %v223_v19 = vsel %vm216_vm1, %v201_v6, %v3039_v9 }
  0xa0   :  { %807 = vrot.lane.b32.xlu1 %v2925_v4, %s2835_s30  ;;  %805 = vrot.lane.b32.xlu0 %v2909_v1, %s2835_s30  ;;  %v127_v21 = vrot.slane %v116_v16, 4  ;;  %v234_v23 = vrot.slane %v223_v19, 4 }
  0xa2   :  { %v3049_v12 = vpop.permute.xlu1 %214  ;;  %v3051_v13 = vpop.permute.xlu0 %107 }
  0xa3   :  { %v224_v35 = vsel %vm216_vm1, %v3049_v12, %v201_v6  ;;  %v117_v36 = vsel %vm109_vm0, %v3051_v13, %v94_v7 }
  0xa4   :  { %705 = vrot.lane.b32.xlu1 %v2901_v0, %s2836_s6  ;;  %803 = vrot.lane.b32.xlu0 %v2901_v0, %s2835_s30  ;;  %v233_v38 = vrot.slane %v224_v35, 4  ;;  %v126_v39 = vrot.slane %v117_v36, 4 }
  0xa6   :  { %v69_v14 = vpop.permute.xlu1 %68  ;;  %v67_v15 = vpop.permute.xlu0 %66 }
  0xa7   :  { %v91_v20 = vsel %vm84_vm2, %v67_v15, %v69_v14 }
  0xa8   :  { %780 = vrot.lane.b32.xlu1 %v2909_v1, %s2837_s7  ;;  %707 = vrot.lane.b32.xlu0 %v2909_v1, %s2836_s6  ;;  %v3082_v26 = vsel %vm142_vm3, %v91_v20, %v127_v21 }
  0xa9   :  { %v160_v31 = vmul.f32 %v152_v27, %v3082_v26 }
  0xaa   :  { %v3067_v17 = vpop.permute.xlu1 %99  ;;  %v98_v18 = vpop.permute.xlu0 %97 }
  0xab   :  { %v114_v48 = vsel %vm109_vm0, %v98_v18, %v3067_v17  ;;  %v115_v49 = vsel %vm109_vm0, %v3041_v10, %v98_v18 }
  0xac   :  { %809 = vrot.lane.b32.xlu1 %v2933_v5, %s2835_s30  ;;  %782 = vrot.lane.b32.xlu0 %v2925_v4, %s2837_s7  ;;  %v128_v59 = vrot.slane %v115_v49, 4  ;;  %v129_v60 = vrot.slane %v114_v48, 4 }
  0xae   :  { %v178_v24 = vpop.permute.xlu1 %177  ;;  %v176_v25 = vpop.permute.xlu0 %175 }
  0xaf   :  { %v198_v29 = vsel %vm191_vm4, %v176_v25, %v178_v24 }
  0xb0   :  { %719 = vrot.lane.b32.xlu1 %v2919_v3, %s2836_s6  ;;  %811 = vrot.lane.b32.xlu0 %v3079_v22, %s2835_s30  ;;  %v3091_v30 = vsel %vm142_vm3, %v198_v29, %v234_v23 }
  0xb1   :  { %v266_v32 = vmul.f32 %v258_v28, %v3091_v30 }
  0xb2   :  { %v3095_v33 = vpop.permute.xlu1 %206  ;;  %v205_v34 = vpop.permute.xlu0 %204 }
  0xb3   :  { %v2468_v37 = vpack.c.bf16 %v266_v32, %v160_v31  ;;  %v221_v52 = vsel %vm216_vm1, %v205_v34, %v3095_v33  ;;  %v222_v55 = vsel %vm216_vm1, %v3039_v9, %v205_v34  ;;  %v260_v9 = vld [vmem:[#allocation6 + $0x58] sm:$0xff] }
  0xb4   :  { %709 = vrot.lane.b32.xlu1 %v2925_v4, %s2836_s6  ;;  %778 = vrot.lane.b32.xlu0 %v2901_v0, %s2837_s7  ;;  %v235_v62 = vrot.slane %v222_v55, 4  ;;  %v236_v63 = vrot.slane %v221_v52, 4  ;;  %v576_v55 = vld [vmem:[#allocation6 + $0x108] sm:$0xff] }
  0xb5   :  { %2469 = vmatprep.subr.bf16.mxu0 %v2468_v37 }
  0xb6   :  { %v3107_v40 = vpop.permute.xlu1 %189  ;;  %v3109_v41 = vpop.permute.xlu0 %80 }
  0xb7   :  { %v199_v44 = vsel %vm191_vm4, %v3107_v40, %v176_v25  ;;  %v92_v45 = vsel %vm84_vm2, %v3109_v41, %v67_v15  ;;  %v259_v15 = vld [vmem:[#allocation6 + $0x50] sm:$0xff] }
  0xb8   :  { %784 = vrot.lane.b32.xlu1 %v2933_v5, %s2837_s7  ;;  %711 = vrot.lane.b32.xlu0 %v2933_v5, %s2836_s6  ;;  %v3122_v46 = vsel %vm142_vm3, %v92_v45, %v126_v39  ;;  %v3125_v47 = vsel %vm142_vm3, %v199_v44, %v233_v38  ;;  %v1014_v38 = vld [vmem:[#allocation6 + $0x280] sm:$0xff] }
  0xb9   :  { %4219 = vst [vmem:[#allocation12_spill] sm:$0xff] %v3122_v46  ;;  %v159_v50 = vmul.f32 %v151_v42, %v3122_v46  ;;  %v265_v51 = vmul.f32 %v257_v43, %v3125_v47  ;;  %v1038_v44 = vld [vmem:[#allocation6 + $0x2c0] sm:$0xff]  ;;  %v3216_v49 = vmul.f32 %v1014_v38, %v3091_v30 }
  0xba   :  { %v3138_v53 = vpop.permute.xlu1 %72  ;;  %v71_v54 = vpop.permute.xlu0 %70 }
  0xbb   :  { %v89_v56 = vsel %vm84_vm2, %v71_v54, %v3138_v53  ;;  %v90_v57 = vsel %vm84_vm2, %v69_v14, %v71_v54  ;;  %v2470_v58 = vpack.c.bf16 %v265_v51, %v159_v50  ;;  %v153_v14 = vld [vmem:[#allocation6 + $0x10] sm:$0xff] }
  0xbc   :  { %911 = vrot.lane.b32.xlu1 %v2909_v1, %s2838_s8  ;;  %786 = vrot.lane.b32.xlu0 %v3079_v22, %s2837_s7  ;;  %v3155_v8 = vsel %vm142_vm3, %v89_v56, %v129_v60  ;;  %v3158_v10 = vsel %vm142_vm3, %v90_v57, %v128_v59  ;;  %v470_v59 = vld [vmem:[#allocation6 + $0xc8] sm:$0xff] }
  0xbd   :  { %2471 = vmatpush1.bf16.msra.mxu0 %v2470_v58  ;;  %v162_v21 = vmul.f32 %v154_v61, %v3155_v8  ;;  %v161_v25 = vmul.f32 %v153_v14, %v3158_v10  ;;  %v364_v58 = vld [vmem:[#allocation6 + $0x88] sm:$0xff] }
  0xbe   :  { %v3152_v6 = vpop.permute.xlu1 %181  ;;  %v180_v7 = vpop.permute.xlu0 %179 }
  0xbf   :  { %v196_v16 = vsel %vm191_vm4, %v180_v7, %v3152_v6  ;;  %v197_v18 = vsel %vm191_vm4, %v178_v24, %v180_v7 }
  0xc0   :  { %909 = vrot.lane.b32.xlu1 %v2901_v0, %s2838_s8  ;;  %913 = vrot.lane.b32.xlu0 %v2925_v4, %s2838_s8  ;;  %v3170_v19 = vsel %vm142_vm3, %v196_v16, %v236_v63  ;;  %v3173_v20 = vsel %vm142_vm3, %v197_v18, %v235_v62  ;;  %v1021_v18 = vld [vmem:[#allocation6 + $0x2b8] sm:$0xff] }
  0xc1   :  { %v268_v23 = vmul.f32 %v260_v9, %v3170_v19  ;;  %v267_v24 = vmul.f32 %v259_v15, %v3173_v20 }
  0xc2   :  { %v3179_v27 = vpop.permute.xlu1 %308  ;;  %v307_v28 = vpop.permute.xlu0 %306 }
  0xc3   :  { %v2496_v29 = vpack.c.bf16 %v268_v23, %v162_v21  ;;  %v2498_v31 = vpack.c.bf16 %v267_v24, %v161_v25  ;;  %v329_v37 = vsel %vm322_vm5, %v307_v28, %v3179_v27 }
  0xc4   :  { %886 = vrot.lane.b32.xlu1 %v2909_v1, %s2839_s9  ;;  %101 = vrot.lane.b32.xlu0 %v3079_v22, %s2825_s21  ;;  %v340_v39 = vrot.slane %v329_v37, 4 }
  0xc5   :  { %2497 = vmatprep.subr.bf16.mxu1 %v2496_v29  ;;  %v363_v29 = vld [vmem:[#allocation6 + $0x80] sm:$0xff] }
  0xc6   :  { %v3185_v32 = vpop.permute.xlu1 %414  ;;  %2499 = vmatpush1.bf16.msra.mxu1 %v2498_v31  ;;  %v413_v34 = vpop.permute.xlu0 %412  ;;  %v469_v31 = vld [vmem:[#allocation6 + $0xc0] sm:$0xff] }
  0xc7   :  { %v435_v54 = vsel %vm428_vm7, %v413_v34, %v3185_v32 }
  0xc8   :  { %915 = vrot.lane.b32.xlu1 %v2933_v5, %s2838_s8  ;;  %888 = vrot.lane.b32.xlu0 %v2925_v4, %s2839_s9  ;;  %v446_v30 = vrot.slane %v435_v54, 4 }
  0xca   :  { %v3192_v35 = vpop.permute.xlu1 %426  ;;  %v3194_v36 = vpop.permute.xlu0 %320 }
  0xcb   :  { %v436_v14 = vsel %vm428_vm7, %v3192_v35, %v413_v34  ;;  %v330_v15 = vsel %vm322_vm5, %v3194_v36, %v307_v28  ;;  %v1045_v34 = vld [vmem:[#allocation6 + $0x2f8] sm:$0xff] }
  0xcc   :  { %884 = vrot.lane.b32.xlu1 %v2901_v0, %s2839_s9  ;;  %917 = vrot.lane.b32.xlu0 %v3079_v22, %s2838_s8  ;;  %v445_v21 = vrot.slane %v436_v14, 4  ;;  %v339_v23 = vrot.slane %v330_v15, 4  ;;  %v1039_v14 = vld [vmem:[#allocation6 + $0x2c8] sm:$0xff]  ;;  %v1040_v15 = vld [vmem:[#allocation6 + $0x2d0] sm:$0xff] }
  0xce   :  { %v3204_v42 = vpop.permute.xlu1 %283  ;;  %v282_v43 = vpop.permute.xlu0 %281 }
  0xcf   :  { %v304_v45 = vsel %vm297_vm6, %v282_v43, %v3204_v42 }
  0xd0   :  { %v356_v48 = vsel %vm142_vm3, %v304_v45, %v340_v39  ;;  %890 = vrot.lane.b32.xlu1 %v2933_v5, %s2839_s9  ;;  %74 = vrot.lane.b32.xlu0 %v3079_v22, %s2826_s2 }
  0xd1   :  { %v3218_v50 = vmul.f32 %v1038_v44, %v356_v48  ;;  %v372_v62 = vmul.f32 %v364_v58, %v356_v48  ;;  %v3286_v48 = vmul.f32 %v1021_v18, %v3125_v47 }
  0xd2   :  { %v3220_v51 = vpop.permute.xlu1 %312  ;;  %v311_v52 = vpop.permute.xlu0 %310 }
  0xd3   :  { %v327_v28 = vsel %vm322_vm5, %v311_v52, %v3220_v51  ;;  %v328_v37 = vsel %vm322_vm5, %v3179_v27, %v311_v52  ;;  %v3283_v27 = vcombine.high %v3079_v22, %v3079_v22  ;;  %4221 = vst [vmem:[#allocation14_spill] sm:$0xff] %v3286_v48  ;;  %v1016_v52 = vld [vmem:[#allocation6 + $0x290] sm:$0xff] }
  0xd4   :  { %208 = vrot.lane.b32.xlu1 %v3079_v22, %s2824_s20  ;;  %892 = vrot.lane.b32.xlu0 %v3079_v22, %s2839_s9  ;;  %v341_v58 = vrot.slane %v328_v37, 4 }
  0xd6   :  { %v3232_v56 = vpop.permute.xlu1 %389  ;;  %v388_v57 = vpop.permute.xlu0 %387 }
  0xd7   :  { %v410_v60 = vsel %vm403_vm8, %v388_v57, %v3232_v56 }
  0xd8   :  { %v3238_v61 = vsel %vm142_vm3, %v410_v60, %v446_v30  ;;  %183 = vrot.lane.b32.xlu1 %v3079_v22, %s2827_s22  ;;  %314 = vrot.lane.b32.xlu0 %v3079_v22, %s2828_s23 }
  0xd9   :  { %v478_v63 = vmul.f32 %v470_v59, %v3238_v61  ;;  %v342_v59 = vrot.slane %v327_v28, 4 }
  0xda   :  { %v3245_v7 = vpop.permute.xlu1 %418  ;;  %v417_v9 = vpop.permute.xlu0 %416 }
  0xdb   :  { %v2472_v16 = vpack.c.bf16 %v478_v63, %v372_v62  ;;  %v433_v60 = vsel %vm428_vm7, %v417_v9, %v3245_v7  ;;  %v434_v62 = vsel %vm428_vm7, %v3185_v32, %v417_v9  ;;  %v3314_v9 = vmul.f32 %v1016_v52, %v3170_v19 }
  0xdc   :  { %420 = vrot.lane.b32.xlu1 %v3079_v22, %s2829_s24  ;;  %289 = vrot.lane.b32.xlu0 %v3079_v22, %s2823_s17  ;;  %v447_v37 = vrot.slane %v434_v62, 4 }
  0xdd   :  { %2473 = vmatprep.subr.bf16.mxu0 %v2472_v16 }
  0xde   :  { %v3257_v25 = vpop.permute.xlu1 %401  ;;  %v3259_v24 = vpop.permute.xlu0 %295 }
  0xdf   :  { %4220 = vst [vmem:[#allocation13_spill] sm:$0xff] %v3259_v24  ;;  %v411_v38 = vsel %vm403_vm8, %v3257_v25, %v388_v57  ;;  %v305_v39 = vsel %vm297_vm6, %v3259_v24, %v282_v43  ;;  %v1015_v57 = vld [vmem:[#allocation6 + $0x288] sm:$0xff] }
  0xe0   :  { %v3274_v44 = vsel %vm142_vm3, %v411_v38, %v445_v21  ;;  %v355_v45 = vsel %vm142_vm3, %v305_v39, %v339_v23  ;;  %395 = vrot.lane.b32.xlu1 %v3079_v22, %s2830_s25  ;;  %501 = vrot.lane.b32.xlu0 %v3079_v22, %s2833_s28  ;;  %v448_v38 = vrot.slane %v433_v60, 4 }
  0xe1   :  { %v371_v43 = vmul.f32 %v363_v29, %v355_v45  ;;  %v477_v54 = vmul.f32 %v469_v31, %v3274_v44  ;;  %v3289_v30 = vmul.f32 %v1045_v34, %v355_v45  ;;  %v3317_v31 = vmul.f32 %v1015_v57, %v3173_v20 }
  0xe2   :  { %v3297_v63 = vpop.permute.xlu1 %287  ;;  %v286_v47 = vpop.permute.xlu0 %285 }
  0xe3   :  { %4222 = vst [vmem:[#allocation15_spill] sm:$0xff] %v3289_v30  ;;  %v302_v16 = vsel %vm297_vm6, %v286_v47, %v3297_v63  ;;  %v303_v18 = vsel %vm297_vm6, %v3204_v42, %v286_v47  ;;  %v2474_v21 = vpack.c.bf16 %v477_v54, %v371_v43  ;;  %v366_v42 = vld [vmem:[#allocation6 + $0x98] sm:$0xff]  ;;  %v365_v54 = vld [vmem:[#allocation6 + $0x90] sm:$0xff] }
  0xe4   :  { %v357_v29 = vsel %vm142_vm3, %v303_v18, %v341_v58  ;;  %v358_v32 = vsel %vm142_vm3, %v302_v16, %v342_v59  ;;  %210 = vrot.lane.b32.xlu1 %v3283_v27, %s2824_s20  ;;  %103 = vrot.lane.b32.xlu0 %v3283_v27, %s2825_s21  ;;  %v472_v43 = vld [vmem:[#allocation6 + $0xd8] sm:$0xff]  ;;  %v471_v58 = vld [vmem:[#allocation6 + $0xd0] sm:$0xff]  ;;  %v4201_v59 = vmov 0.0  }
  0xe5   :  { %2475 = vmatpush1.bf16.msra.mxu0 %v2474_v21  ;;  %v3319_v34 = vmul.f32 %v1039_v14, %v357_v29  ;;  %v3321_v28 = vmul.f32 %v1040_v15, %v358_v32  ;;  %1323 = vmatprep.mubr.f32.mxu0 %v4201_v59  ;;  %v373_v14 = vmul.f32 %v365_v54, %v357_v29 }
  0xe6   :  { %v3323_v39 = vpop.permute.xlu1 %393  ;;  %v392_v45 = vpop.permute.xlu0 %391  ;;  %1394 = vmatprep.mubr.f32.mxu1 %v4201_v59 }
  0xe7   :  { %v408_v19 = vsel %vm403_vm8, %v392_v45, %v3323_v39  ;;  %v409_v20 = vsel %vm403_vm8, %v3232_v56, %v392_v45  ;;  %v374_v56 = vmul.f32 %v366_v42, %v358_v32 }
  0xe8   :  { %v3337_v60 = vsel %vm142_vm3, %v409_v20, %v447_v37  ;;  %v3340_v62 = vsel %vm142_vm3, %v408_v19, %v448_v38  ;;  %105 = vrot.lane.b32.xlu1 %v2911_v2, %s2825_s21  ;;  %76 = vrot.lane.b32.xlu0 %v3283_v27, %s2826_s2  ;;  %v1062_v20 = vld [vmem:[#allocation6 + $0x300] sm:$0xff] }
  0xe9   :  { %v480_v47 = vmul.f32 %v472_v43, %v3340_v62  ;;  %v479_v15 = vmul.f32 %v471_v58, %v3337_v60  ;;  %v1118_v58 = vld [vmem:[#allocation6 + $0x340] sm:$0xff]  ;;  %v3393_v23 = vmul.f32 %v1062_v20, %v3238_v61  ;;  %v682_v61 = vld [vmem:[#allocation6 + $0x148] sm:$0xff] }
  0xea   :  { %v3349_v16 = vpop.permute.xlu1 %520  ;;  %v519_v18 = vpop.permute.xlu0 %518 }
  0xeb   :  { %v2500_v21 = vpack.c.bf16 %v480_v47, %v374_v56  ;;  %v2502_v37 = vpack.c.bf16 %v479_v15, %v373_v14  ;;  %v541_v56 = vsel %vm534_vm10, %v519_v18, %v3349_v16 }
  0xec   :  { %212 = vrot.lane.b32.xlu1 %v2911_v2, %s2824_s20  ;;  %185 = vrot.lane.b32.xlu0 %v3283_v27, %s2827_s22  ;;  %v552_v57 = vrot.slane %v541_v56, 4 }
  0xed   :  { %2501 = vmatprep.subr.bf16.mxu1 %v2500_v21 }
  0xee   :  { %v3355_v32 = vpop.permute.xlu1 %626  ;;  %2503 = vmatpush1.bf16.msra.mxu1 %v2502_v37  ;;  %v625_v29 = vpop.permute.xlu0 %624 }
  0xef   :  { %v647_v21 = vsel %vm640_vm11, %v625_v29, %v3355_v32 }
  0xf0   :  { %187 = vrot.lane.b32.xlu1 %v2911_v2, %s2827_s22  ;;  %78 = vrot.lane.b32.xlu0 %v2911_v2, %s2826_s2  ;;  %v658_v59 = vrot.slane %v647_v21, 4 }
  0xf2   :  { %v3361_v42 = vpop.permute.xlu1 %638  ;;  %v3363_v38 = vpop.permute.xlu0 %532 }
  0xf3   :  { %4223 = vst [vmem:[#allocation16_spill] sm:$0xff] %v3361_v42  ;;  %4224 = vst [vmem:[#allocation17_spill] sm:$0xff] %v3363_v38  ;;  %v542_v30 = vsel %vm534_vm10, %v3363_v38, %v519_v18 }
  0xf4   :  { %422 = vrot.lane.b32.xlu1 %v3283_v27, %s2829_s24  ;;  %316 = vrot.lane.b32.xlu0 %v3283_v27, %s2828_s23 }
  0xf6   :  { %v3371_v45 = vpop.permute.xlu1 %495  ;;  %v494_v43 = vpop.permute.xlu0 %493 }
  0xf7   :  { %v516_v54 = vsel %vm509_vm9, %v494_v43, %v3371_v45 }
  0xf8   :  { %v1094_v19 = vrot.slane %v516_v54, 4  ;;  %318 = vrot.lane.b32.xlu1 %v2911_v2, %s2828_s23  ;;  %291 = vrot.lane.b32.xlu0 %v3283_v27, %s2823_s17 }
  0xfa   :  { %v1110_v47 = vsel %vm142_vm3, %v516_v54, %v1094_v19  ;;  %v3385_v14 = vpop.permute.xlu1 %524  ;;  %v523_v15 = vpop.permute.xlu0 %522 }
  0xfb   :  { %4225 = vst [vmem:[#allocation18_spill] sm:$0xff] %v3385_v14  ;;  %v3390_v37 = vmul.f32 %v1118_v58, %v1110_v47  ;;  %v568_v58 = vsel %vm142_vm3, %v516_v54, %v552_v57  ;;  %v648_v54 = vsel %vm640_vm11, %v3361_v42, %v625_v29  ;;  %v1069_v29 = vld [vmem:[#allocation6 + $0x338] sm:$0xff]  ;;  %v540_v18 = vsel %vm534_vm10, %v3349_v16, %v523_v15 }
  0xfc   :  { %424 = vrot.lane.b32.xlu1 %v2911_v2, %s2829_s24  ;;  %397 = vrot.lane.b32.xlu0 %v3283_v27, %s2830_s25  ;;  %v584_v21 = vmul.f32 %v576_v55, %v568_v58  ;;  %v657_v55 = vrot.slane %v648_v54, 4  ;;  %v681_v58 = vld [vmem:[#allocation6 + $0x140] sm:$0xff]  ;;  %v1125_v54 = vld [vmem:[#allocation6 + $0x378] sm:$0xff]  ;;  %v539_v16 = vsel %vm534_vm10, %v523_v15, %v3385_v14 }
  0xfe   :  { %v3403_v47 = vpop.permute.xlu1 %601  ;;  %v600_v20 = vpop.permute.xlu0 %599 }
  0xff   :  { %v622_v56 = vsel %vm615_vm12, %v600_v20, %v3403_v47 }
 0x100   :  { %v674_v52 = vsel %vm142_vm3, %v622_v56, %v658_v59  ;;  %399 = vrot.lane.b32.xlu1 %v2911_v2, %s2830_s25  ;;  %293 = vrot.lane.b32.xlu0 %v2911_v2, %s2823_s17  ;;  %v575_v56 = vld [vmem:[#allocation6 + $0x100] sm:$0xff] }
 0x101   :  { %v690_v19 = vmul.f32 %v682_v61, %v674_v52  ;;  %v551_v52 = vrot.slane %v542_v30, 4 }
 0x102   :  { %v3413_v48 = vpop.permute.xlu1 %630  ;;  %v629_v57 = vpop.permute.xlu0 %628 }
 0x103   :  { %4226 = vst [vmem:[#allocation19_spill] sm:$0xff] %v3413_v48  ;;  %v2476_v59 = vpack.c.bf16 %v690_v19, %v584_v21 }
 0x104   :  { %528 = vrot.lane.b32.xlu1 %v3283_v27, %s2831_s26  ;;  %526 = vrot.lane.b32.xlu0 %v3079_v22, %s2831_s26 }
 0x105   :  { %2477 = vmatprep.subr.bf16.mxu0 %v2476_v59 }
 0x106   :  { %v3425_v61 = vpop.permute.xlu1 %613  ;;  %v3427_v46 = vpop.permute.xlu0 %507 }
 0x107   :  { %4227 = vst [vmem:[#allocation20_spill] sm:$0xff] %v3425_v61  ;;  %4228 = vst [vmem:[#allocation21_spill] sm:$0xff] %v3427_v46  ;;  %v623_v19 = vsel %vm615_vm12, %v3425_v61, %v600_v20  ;;  %v517_v21 = vsel %vm509_vm9, %v3427_v46, %v494_v43  ;;  %v3448_v43 = vmul.f32 %v1069_v29, %v3274_v44  ;;  %v554_v29 = vrot.slane %v539_v16, 4  ;;  %v683_v16 = vld [vmem:[#allocation6 + $0x150] sm:$0xff] }
 0x108   :  { %v673_v30 = vsel %vm142_vm3, %v623_v19, %v657_v55  ;;  %v567_v59 = vsel %vm142_vm3, %v517_v21, %v551_v52  ;;  %v1101_v42 = vrot.slane %v517_v21, 4  ;;  %634 = vrot.lane.b32.xlu1 %v3283_v27, %s2832_s27  ;;  %632 = vrot.lane.b32.xlu0 %v3079_v22, %s2832_s27  ;;  %v553_v55 = vrot.slane %v540_v18, 4  ;;  %v1120_v18 = vld [vmem:[#allocation6 + $0x350] sm:$0xff] }
 0x109   :  { %v689_v20 = vmul.f32 %v681_v58, %v673_v30  ;;  %v583_v61 = vmul.f32 %v575_v56, %v567_v59  ;;  %4229 = vst [vmem:[#allocation22_spill] sm:$0xff] %v3448_v43  ;;  %v645_v52 = vsel %vm640_vm11, %v629_v57, %v3413_v48  ;;  %v646_v19 = vsel %vm640_vm11, %v3355_v32, %v629_v57 }
 0x10a   :  { %v1117_v46 = vsel %vm142_vm3, %v517_v21, %v1101_v42  ;;  %v3457_v38 = vpop.permute.xlu1 %499  ;;  %v498_v24 = vpop.permute.xlu0 %497  ;;  %v577_v42 = vld [vmem:[#allocation6 + $0x110] sm:$0xff]  ;;  %v578_v21 = vld [vmem:[#allocation6 + $0x118] sm:$0xff] }
 0x10b   :  { %v3459_v15 = vmul.f32 %v1125_v54, %v1117_v46  ;;  %v514_v44 = vsel %vm509_vm9, %v498_v24, %v3457_v38  ;;  %v3467_v58 = vsel %vm509_vm9, %v3371_v45, %v498_v24  ;;  %v2478_v56 = vpack.c.bf16 %v689_v20, %v583_v61  ;;  %v1064_v46 = vld [vmem:[#allocation6 + $0x310] sm:$0xff]  ;;  %v684_v20 = vld [vmem:[#allocation6 + $0x158] sm:$0xff] }
 0x10c   :  { %v1096_v32 = vrot.slane %v514_v44, 4  ;;  %530 = vrot.lane.b32.xlu1 %v2911_v2, %s2831_s26  ;;  %503 = vrot.lane.b32.xlu0 %v3283_v27, %s2833_s28  ;;  %v569_v57 = vsel %vm142_vm3, %v3467_v58, %v553_v55  ;;  %v659_v45 = vrot.slane %v646_v19, 4  ;;  %v660_v61 = vrot.slane %v645_v52, 4 }
 0x10d   :  { %4230 = vst [vmem:[#allocation23_spill] sm:$0xff] %v3459_v15  ;;  %2479 = vmatpush1.bf16.msra.mxu0 %v2478_v56  ;;  %v570_v30 = vsel %vm142_vm3, %v514_v44, %v554_v29  ;;  %v3490_v19 = vmul.f32 %v1064_v46, %v3340_v62  ;;  %v585_v56 = vmul.f32 %v577_v42, %v569_v57 }
 0x10e   :  { %v1112_v54 = vsel %vm142_vm3, %v514_v44, %v1096_v32  ;;  %v3479_v59 = vpop.permute.xlu1 %605  ;;  %v604_v48 = vpop.permute.xlu0 %603 }
 0x10f   :  { %v3481_v14 = vmul.f32 %v1120_v18, %v1112_v54  ;;  %v620_v55 = vsel %vm615_vm12, %v604_v48, %v3479_v59  ;;  %v621_v52 = vsel %vm615_vm12, %v3403_v47, %v604_v48  ;;  %v586_v18 = vmul.f32 %v578_v21, %v570_v30 }
 0x110   :  { %v675_v44 = vsel %vm142_vm3, %v621_v52, %v659_v45  ;;  %v676_v29 = vsel %vm142_vm3, %v620_v55, %v660_v61  ;;  %609 = vrot.lane.b32.xlu1 %v3283_v27, %s2834_s29  ;;  %607 = vrot.lane.b32.xlu0 %v3079_v22, %s2834_s29  ;;  %v755_v55 = vld [vmem:[#allocation6 + $0x188] sm:$0xff] }
 0x111   :  { %v691_v32 = vmul.f32 %v683_v16, %v675_v44  ;;  %v692_v54 = vmul.f32 %v684_v20, %v676_v29  ;;  %v861_v44 = vld [vmem:[#allocation6 + $0x1c8] sm:$0xff] }
 0x112   :  { %v808_v47 = vpop.permute.xlu1 %807  ;;  %v806_v62 = vpop.permute.xlu0 %805 }
 0x113   :  { %v2504_v46 = vpack.c.bf16 %v692_v54, %v586_v18  ;;  %v2506_v42 = vpack.c.bf16 %v691_v32, %v585_v56  ;;  %v825_v30 = vsel %vm819_vm13, %v806_v62, %v808_v47 }
 0x114   :  { %505 = vrot.lane.b32.xlu1 %v2911_v2, %s2833_s28  ;;  %636 = vrot.lane.b32.xlu0 %v2911_v2, %s2832_s27  ;;  %v837_v20 = vrot.slane %v825_v30, 4 }
 0x115   :  { %2505 = vmatprep.subr.bf16.mxu1 %v2504_v46  ;;  %v730_v46 = vrot.slane %v2901_v0, 4 }
 0x116   :  { %v706_v57 = vpop.permute.xlu1 %705  ;;  %2507 = vmatpush1.bf16.msra.mxu1 %v2506_v42  ;;  %v3504_v45 = vpop.permute.xlu0 %803 }
 0x117   :  { %v826_v30 = vsel %vm819_vm13, %v3504_v45, %v806_v62 }
 0x118   :  { %813 = vrot.lane.b32.xlu1 %v3283_v27, %s2835_s30  ;;  %611 = vrot.lane.b32.xlu0 %v2911_v2, %s2834_s29  ;;  %v836_v0 = vrot.slane %v826_v30, 4 }
 0x11a   :  { %v781_v61 = vpop.permute.xlu1 %780  ;;  %v708_v21 = vpop.permute.xlu0 %707 }
 0x11b   :  { %v728_v16 = vsel %vm4213_vm14, %v706_v57, %v708_v21 }
 0x11c   :  { %713 = vrot.lane.b32.xlu1 %v3079_v22, %s2836_s6  ;;  %815 = vrot.lane.b32.xlu0 %v2911_v2, %s2835_s30  ;;  %v747_v52 = vsel %vm142_vm3, %v728_v16, %v2909_v1 }
 0x11d   :  { %v763_v22 = vmul.f32 %v755_v55, %v747_v52  ;;  %v754_v55 = vld [vmem:[#allocation6 + $0x180] sm:$0xff] }
 0x11e   :  { %v810_v56 = vpop.permute.xlu1 %809  ;;  %v783_v29 = vpop.permute.xlu0 %782 }
 0x11f   :  { %v800_v18 = vsel %vm4214_vm15, %v781_v61, %v783_v29  ;;  %v824_v62 = vsel %vm819_vm13, %v808_v47, %v810_v56 }
 0x120   :  { %v853_v32 = vsel %vm142_vm3, %v800_v18, %v837_v20  ;;  %788 = vrot.lane.b32.xlu1 %v3283_v27, %s2837_s7  ;;  %715 = vrot.lane.b32.xlu0 %v3283_v27, %s2836_s6  ;;  %v860_v18 = vld [vmem:[#allocation6 + $0x1c0] sm:$0xff]  ;;  %v838_v30 = vrot.slane %v824_v62, 4 }
 0x121   :  { %v869_v54 = vmul.f32 %v861_v44, %v853_v32 }
 0x122   :  { %v3531_v42 = vpop.permute.xlu1 %719  ;;  %v3533_v1 = vpop.permute.xlu0 %811 }
 0x123   :  { %v729_v16 = vsel %vm4213_vm14, %v3531_v42, %v706_v57  ;;  %v2480_v20 = vpack.c.bf16 %v869_v54, %v763_v22  ;;  %v823_v47 = vsel %vm819_vm13, %v810_v56, %v3533_v1 }
 0x124   :  { %817 = vrot.lane.b32.xlu1 %v2919_v3, %s2835_s30  ;;  %790 = vrot.lane.b32.xlu0 %v2911_v2, %s2837_s7  ;;  %v746_v52 = vsel %vm142_vm3, %v729_v16, %v730_v46  ;;  %v732_v16 = vrot.slane %v2925_v4, 4  ;;  %v862_v4 = vld [vmem:[#allocation6 + $0x1d0] sm:$0xff] }
 0x125   :  { %2481 = vmatprep.subr.bf16.mxu0 %v2480_v20  ;;  %v762_v54 = vmul.f32 %v754_v55, %v746_v52  ;;  %v839_v52 = vrot.slane %v823_v47, 4 }
 0x126   :  { %v710_v44 = vpop.permute.xlu1 %709  ;;  %v3546_v32 = vpop.permute.xlu0 %778 }
 0x127   :  { %v801_v57 = vsel %vm4214_vm15, %v3546_v32, %v781_v61  ;;  %v727_v55 = vsel %vm4213_vm14, %v708_v21, %v710_v44  ;;  %v756_v21 = vld [vmem:[#allocation6 + $0x190] sm:$0xff] }
 0x128   :  { %v852_v22 = vsel %vm142_vm3, %v801_v57, %v836_v0  ;;  %792 = vrot.lane.b32.xlu1 %v2919_v3, %s2837_s7  ;;  %717 = vrot.lane.b32.xlu0 %v2911_v2, %s2836_s6 }
 0x129   :  { %v868_v46 = vmul.f32 %v860_v18, %v852_v22  ;;  %v863_v22 = vld [vmem:[#allocation6 + $0x1d8] sm:$0xff] }
 0x12a   :  { %v785_v20 = vpop.permute.xlu1 %784  ;;  %v3559_v24 = vpop.permute.xlu0 %711 }
 0x12b   :  { %v799_v61 = vsel %vm4214_vm15, %v783_v29, %v785_v20  ;;  %v726_v0 = vsel %vm4213_vm14, %v710_v44, %v3559_v24  ;;  %v2482_v57 = vpack.c.bf16 %v868_v46, %v762_v54  ;;  %v757_v29 = vld [vmem:[#allocation6 + $0x198] sm:$0xff]  ;;  %v748_v44 = vsel %vm142_vm3, %v727_v55, %v732_v16 }
 0x12c   :  { %921 = vrot.lane.b32.xlu1 %v2911_v2, %s2838_s8  ;;  %919 = vrot.lane.b32.xlu0 %v3283_v27, %s2838_s8  ;;  %v854_v56 = vsel %vm142_vm3, %v799_v61, %v838_v30  ;;  %v749_v18 = vsel %vm142_vm3, %v726_v0, %v2933_v5  ;;  %v764_v61 = vmul.f32 %v756_v21, %v748_v44  ;;  %vm925_vm14 = vcmp.lt.s32.totalorder %v3047_v11, 119 }
 0x12d   :  { %2483 = vmatpush1.bf16.msra.mxu0 %v2482_v57  ;;  %v870_v48 = vmul.f32 %v862_v4, %v854_v56  ;;  %v765_v5 = vmul.f32 %v757_v29, %v749_v18  ;;  %v991_v56 = vld [vmem:[#allocation6 + $0x248] sm:$0xff] }
 0x12e   :  { %v912_v62 = vpop.permute.xlu1 %911  ;;  %v3578_v54 = vpop.permute.xlu0 %786  ;;  %v967_v18 = vld [vmem:[#allocation6 + $0x208] sm:$0xff] }
 0x12f   :  { %v798_v46 = vsel %vm4214_vm15, %v785_v20, %v3578_v54  ;;  %v2510_v20 = vpack.c.bf16 %v870_v48, %v764_v61  ;;  %vm4218_vm15 = vcmp.lt.s32.totalorder %v3047_v11, 120 }
 0x130   :  { %v855_v30 = vsel %vm142_vm3, %v798_v46, %v839_v52  ;;  %896 = vrot.lane.b32.xlu1 %v2911_v2, %s2839_s9  ;;  %894 = vrot.lane.b32.xlu0 %v3283_v27, %s2839_s9  ;;  %v999_v46 = vmul.f32 %v991_v56, %v3158_v10 }
 0x131   :  { %v871_v47 = vmul.f32 %v863_v22, %v855_v30  ;;  %v1095_v30 = vrot.slane %v3467_v58, 4 }
 0x132   :  { %v3589_v0 = vpop.permute.xlu1 %909  ;;  %v914_v57 = vpop.permute.xlu0 %913 }
 0x133   :  { %4231 = vst [vmem:[#allocation24_spill] sm:$0xff] %v3589_v0  ;;  %v2508_v16 = vpack.c.bf16 %v871_v47, %v765_v5  ;;  %v931_v4 = vsel %vm925_vm14, %v912_v62, %v914_v57  ;;  %v932_v21 = vsel %vm925_vm14, %v3589_v0, %v912_v62  ;;  %v990_v47 = vld [vmem:[#allocation6 + $0x240] sm:$0xff] }
 0x134   :  { %898 = vrot.lane.b32.xlu1 %v2919_v3, %s2839_s9  ;;  %923 = vrot.lane.b32.xlu0 %v2919_v3, %s2838_s8  ;;  %v943_v52 = vrot.slane %v931_v4, 4  ;;  %v942_v61 = vrot.slane %v932_v21, 4  ;;  %v998_v56 = vmul.f32 %v990_v47, %v3082_v26  ;;  %v1111_v21 = vsel %vm142_vm3, %v3467_v58, %v1095_v30 }
 0x135   :  { %2509 = vmatprep.subr.bf16.mxu1 %v2508_v16  ;;  %v966_v16 = vld [vmem:[#allocation6 + $0x200] sm:$0xff] }
 0x136   :  { %v887_v2 = vpop.permute.xlu1 %886  ;;  %2511 = vmatpush1.bf16.msra.mxu1 %v2510_v20  ;;  %v3596_v55 = vpop.permute.xlu0 %101 }
 0x13a   :  { %v916_v29 = vpop.permute.xlu1 %915  ;;  %v889_v22 = vpop.permute.xlu0 %888 }
 0x13b   :  { %v906_v48 = vsel %vm4218_vm15, %v887_v2, %v889_v22  ;;  %v930_v62 = vsel %vm925_vm14, %v914_v57, %v916_v29 }
 0x13c   :  { %v959_v44 = vsel %vm142_vm3, %v906_v48, %v943_v52  ;;  %v113_v48 = vsel %vm109_vm0, %v3067_v17, %v3596_v55  ;;  %v944_v57 = vrot.slane %v930_v62, 4  ;;  %v1063_v17 = vld [vmem:[#allocation6 + $0x308] sm:$0xff] }
 0x13d   :  { %v975_v5 = vmul.f32 %v967_v18, %v959_v44  ;;  %v1119_v18 = vld [vmem:[#allocation6 + $0x348] sm:$0xff]  ;;  %v130_v30 = vrot.slane %v113_v48, 4 }
 0x13e   :  { %v3609_v20 = vpop.permute.xlu1 %884  ;;  %v3611_v4 = vpop.permute.xlu0 %917 }
 0x13f   :  { %v907_v43 = vsel %vm4218_vm15, %v3609_v20, %v887_v2  ;;  %v2484_v52 = vpack.c.bf16 %v999_v46, %v975_v5  ;;  %v1127_v46 = vmul.f32 %v1119_v18, %v1111_v21  ;;  %v968_v5 = vld [vmem:[#allocation6 + $0x210] sm:$0xff] }
 0x140   :  { %v958_v10 = vsel %vm142_vm3, %v907_v43, %v942_v61  ;;  %v929_v43 = vsel %vm925_vm14, %v916_v29, %v3611_v4 }
 0x141   :  { %v974_v44 = vmul.f32 %v966_v16, %v958_v10  ;;  %2485 = vmatprep.subr.bf16.mxu0 %v2484_v52  ;;  %v945_v61 = vrot.slane %v929_v43, 4  ;;  %v993_v16 = vld [vmem:[#allocation6 + $0x258] sm:$0xff]  ;;  %v1071_v10 = vmul.f32 %v1063_v17, %v3337_v60  ;;  %v4233_v43 = vpack.c.bf16 %v3218_v50, %v3216_v49 }
 0x142   :  { %v891_v15 = vpop.permute.xlu1 %890  ;;  %v3626_v0 = vpop.permute.xlu0 %74  ;;  %v969_v52 = vld [vmem:[#allocation6 + $0x218] sm:$0xff]  ;;  %v4234_v49 = vpack.c.bf16 %v3390_v37, %v3393_v23 }
 0x143   :  { %v905_v26 = vsel %vm4218_vm15, %v889_v22, %v891_v15  ;;  %v88_v58 = vsel %vm84_vm2, %v3138_v53, %v3626_v0  ;;  %v2486_v2 = vpack.c.bf16 %v998_v56, %v974_v44  ;;  %v4232_v22 = vpack.c.bf16 %v3319_v34, %v3317_v31  ;;  %v992_v56 = vld [vmem:[#allocation6 + $0x250] sm:$0xff] }
 0x144   :  { %v960_v47 = vsel %vm142_vm3, %v905_v26, %v944_v57  ;;  %v3639_v29 = vsel %vm142_vm3, %v88_v58, %v130_v30  ;;  %v2492_v44 = vpack.c.bf16 %v1127_v46, %v1071_v10  ;;  %v1000_v60 = vmul.f32 %v992_v56, %v3155_v8  ;;  %v3674_v8 = vld [vmem:[%s4196_s1] sm:$0xff] }
 0x145   :  { %2487 = vmatpush1.bf16.msra.mxu0 %v2486_v2  ;;  %v976_v21 = vmul.f32 %v968_v5, %v960_v47  ;;  %v1001_v57 = vmul.f32 %v993_v16, %v3639_v29 }
 0x146   :  { %v209_v62 = vpop.permute.xlu1 %208  ;;  %2489 = vmatprep.subr.bf16.mxu0 %v4232_v22  ;;  %v3644_v53 = vpop.permute.xlu0 %892 }
 0x147   :  { %v904_v18 = vsel %vm4218_vm15, %v891_v15, %v3644_v53  ;;  %v220_v31 = vsel %vm216_vm1, %v3095_v33, %v209_v62  ;;  %v2514_v46 = vpack.c.bf16 %v1000_v60, %v976_v21  ;;  %vm1255_vm15 = vcmask 916480  }
 0x148   :  { %v961_v48 = vsel %vm142_vm3, %v904_v18, %v945_v61  ;;  %v237_v17 = vrot.slane %v220_v31, 4 }
 0x149   :  { %v977_v34 = vmul.f32 %v969_v52, %v961_v48  ;;  %2491 = vmatpush1.bf16.msra.mxu0 %v4233_v43  ;;  %v4235_v52 = vmov 0.0   ;;  %v1065_v48 = vld [vmem:[#allocation6 + $0x318] sm:$0xff] }
 0x14a   :  { %v184_v26 = vpop.permute.xlu1 %183  ;;  %2493 = vmatprep.subr.bf16.mxu0 %v2492_v44  ;;  %v3659_v15 = vpop.permute.xlu0 %314 }
 0x14b   :  { %v195_v58 = vsel %vm191_vm4, %v3152_v6, %v184_v26  ;;  %v326_v33 = vsel %vm322_vm5, %v3220_v51, %v3659_v15  ;;  %v2512_v2 = vpack.c.bf16 %v1001_v57, %v977_v34  ;;  %v1017_v6 = vld [vmem:[#allocation6 + $0x298] sm:$0xff] }
 0x14c   :  { %v253_v50 = vsel %vm142_vm3, %v195_v58, %v237_v17  ;;  %v343_v30 = vrot.slane %v326_v33, 4  ;;  %v1041_v51 = vld [vmem:[#allocation6 + $0x2d8] sm:$0xff] }
 0x14d   :  { %2495 = vmatpush1.bf16.msra.mxu0 %v4234_v49  ;;  %2513 = vmatprep.subr.bf16.mxu1 %v2512_v2  ;;  %v1025_v16 = vmul.f32 %v1017_v6, %v253_v50  ;;  %v1121_v57 = vld [vmem:[#allocation6 + $0x358] sm:$0xff]  ;;  %v4237_v49 = vpack.c.bf16 %v3481_v14, %v3490_v19 }
 0x14e   :  { %v3677_v5 = vpop.permute.xlu1 %420  ;;  %2515 = vmatpush1.bf16.msra.mxu1 %v2514_v46  ;;  %v3679_v47 = vpop.permute.xlu0 %289 }
 0x14f   :  { %v432_v23 = vsel %vm428_vm7, %v3245_v7, %v3677_v5  ;;  %v301_v37 = vsel %vm297_vm6, %v3297_v63, %v3679_v47 }
 0x150   :  { %v3690_v61 = vsel %vm142_vm3, %v301_v37, %v343_v30  ;;  %2184 = vmatmul.mubr.msk.f32.vlgmr.msra.gmra.mrb[0].mxu0 %vm1255_vm15, %v3674_v8  ;;  %v449_v10 = vrot.slane %v432_v23, 4  ;;  %v262_v37 = vld [vmem:[#allocation6 + $0x68] sm:$0xff] }
 0x151   :  { %v1049_v22 = vmul.f32 %v1041_v51, %v3690_v61  ;;  %1465 = vmatprep.mubr.f32.mxu0 %v4235_v52 }
 0x152   :  { %v3696_v56 = vpop.permute.xlu1 %395  ;;  %v3698_v7 = vpop.permute.xlu0 %501 }
 0x153   :  { %v407_v63 = vsel %vm403_vm8, %v3323_v39, %v3696_v56  ;;  %v3708_v18 = vsel %vm509_vm9, %v3457_v38, %v3698_v7  ;;  %v2516_v21 = vpack.c.bf16 %v1049_v22, %v1025_v16  ;;  %v4236_v39 = vpack.c.bf16 %v3321_v28, %v3314_v9  ;;  %v261_v28 = vld [vmem:[#allocation6 + $0x60] sm:$0xff] }
 0x154   :  { %v3711_v44 = vsel %vm142_vm3, %v407_v63, %v449_v10  ;;  %v1097_v31 = vrot.slane %v3708_v18, 4 }
 0x155   :  { %2517 = vmatprep.subr.bf16.mxu1 %v2516_v21  ;;  %v1073_v38 = vmul.f32 %v1065_v48, %v3711_v44 }
 0x156   :  { %v1113_v34 = vsel %vm142_vm3, %v3708_v18, %v1097_v31  ;;  %v211_v43 = vpop.permute.xlu1 %210  ;;  %2519 = vmatpush1.bf16.msra.mxu1 %v4236_v39  ;;  %v104_v60 = vpop.permute.xlu0 %103  ;;  %v263_v31 = vld [vmem:[#allocation6 + $0x70] sm:$0xff] }
 0x157   :  { %v1129_v58 = vmul.f32 %v1121_v57, %v1113_v34  ;;  %v219_v46 = vsel %vm216_vm1, %v209_v62, %v211_v43  ;;  %v112_v9 = vsel %vm109_vm0, %v3596_v55, %v104_v60  ;;  %v264_v34 = vld [vmem:[#allocation6 + $0x78] sm:$0xff] }
 0x158   :  { %v238_v6 = vrot.slane %v219_v46, 4  ;;  %v131_v16 = vrot.slane %v112_v9, 4 }
 0x159   :  { %v2520_v33 = vpack.c.bf16 %v1129_v58, %v1073_v38  ;;  %v157_v38 = vld [vmem:[#allocation6 + $0x30] sm:$0xff]  ;;  %v158_v58 = vld [vmem:[#allocation6 + $0x38] sm:$0xff] }
 0x15a   :  { %v106_v2 = vpop.permute.xlu1 %105  ;;  %v77_v17 = vpop.permute.xlu0 %76 }
 0x15b   :  { %2521 = vmatprep.subr.bf16.mxu1 %v2520_v33  ;;  %v110_v30 = vsel %vm109_vm0, %v106_v2, %v3051_v13  ;;  %v111_v51 = vsel %vm109_vm0, %v104_v60, %v106_v2  ;;  %v87_v14 = vsel %vm84_vm2, %v3626_v0, %v77_v17  ;;  %v269_v0 = vmul.f32 %v261_v28, %v253_v50  ;;  %v155_v60 = vld [vmem:[#allocation6 + $0x20] sm:$0xff] }
 0x15c   :  { %2523 = vmatpush1.bf16.msra.mxu1 %v4237_v49  ;;  %v132_v10 = vrot.slane %v111_v51, 4  ;;  %v133_v63 = vrot.slane %v110_v30, 4  ;;  %v3750_v21 = vsel %vm142_vm3, %v87_v14, %v131_v16  ;;  %vm4245_vm0 = vcmp.lt.s32.totalorder %v3047_v11, 1 }
 0x15e   :  { %v213_v23 = vpop.permute.xlu1 %212  ;;  %v186_v62 = vpop.permute.xlu0 %185 }
 0x15f   :  { %v217_v19 = vsel %vm216_vm1, %v213_v23, %v3049_v12  ;;  %v218_v55 = vsel %vm216_vm1, %v211_v43, %v213_v23  ;;  %v194_v13 = vsel %vm191_vm4, %v184_v26, %v186_v62  ;;  %2185 = vmatmul.mubr.msk.f32.vlgmr.msra.gmra.mrb[0].mxu1 %vm1255_vm15, %v3674_v8  ;;  %v156_v12 = vld [vmem:[#allocation6 + $0x28] sm:$0xff]  ;;  %vm4246_vm1 = vcmp.lt.s32.totalorder %v3047_v11, 127 }
 0x160   :  { %v3746_v22 = vsel %vm142_vm3, %v194_v13, %v238_v6  ;;  %1536 = vmatprep.mubr.f32.mxu1 %v4235_v52  ;;  %v239_v48 = vrot.slane %v218_v55, 4  ;;  %v240_v57 = vrot.slane %v217_v19, 4  ;;  %v164_v28 = vmul.f32 %v156_v12, %v3750_v21 }
 0x161   :  { %v270_v26 = vmul.f32 %v262_v37, %v3746_v22 }
 0x162   :  { %v188_v43 = vpop.permute.xlu1 %187  ;;  %v79_v39 = vpop.permute.xlu0 %78 }
 0x163   :  { %v192_v52 = vsel %vm191_vm4, %v188_v43, %v3107_v40  ;;  %v193_v50 = vsel %vm191_vm4, %v186_v62, %v188_v43  ;;  %v85_v33 = vsel %vm84_vm2, %v79_v39, %v3109_v41  ;;  %v86_v2 = vsel %vm84_vm2, %v77_v17, %v79_v39  ;;  %vm4247_vm2 = vmmov %vm4245_vm0 }
 0x164   :  { %v3764_v46 = vsel %vm142_vm3, %v193_v50, %v239_v48  ;;  %v3767_v49 = vsel %vm142_vm3, %v192_v52, %v240_v57  ;;  %v3770_v40 = vsel %vm142_vm3, %v86_v2, %v132_v10  ;;  %v3773_v9 = vsel %vm142_vm3, %v85_v33, %v133_v63  ;;  %v473_v63 = vld [vmem:[#allocation6 + $0xe0] sm:$0xff]  ;;  %v368_v50 = vld [vmem:[#allocation6 + $0xa8] sm:$0xff]  ;;  %v475_v2 = vld [vmem:[#allocation6 + $0xf0] sm:$0xff] }
 0x165   :  { %v271_v6 = vmul.f32 %v263_v31, %v3764_v46  ;;  %v272_v41 = vmul.f32 %v264_v34, %v3767_v49  ;;  %v163_v17 = vmul.f32 %v155_v60, %v3639_v29  ;;  %v165_v30 = vmul.f32 %v157_v38, %v3770_v40  ;;  %v474_v34 = vld [vmem:[#allocation6 + $0xe8] sm:$0xff]  ;;  %vm4248_vm4 = vmmov %vm4246_vm1 }
 0x166   :  { %v166_v51 = vmul.f32 %v158_v58, %v3773_v9  ;;  %v423_v23 = vpop.permute.xlu1 %422  ;;  %v317_v62 = vpop.permute.xlu0 %316  ;;  %v2524_v14 = vpack.c.bf16 %v270_v26, %v164_v28  ;;  %v481_v60 = vmul.f32 %v473_v63, %v3711_v44  ;;  %v476_v28 = vld [vmem:[#allocation6 + $0xf8] sm:$0xff] }
 0x167   :  { %v2526_v19 = vpack.c.bf16 %v269_v0, %v163_v17  ;;  %v2554_v55 = vpack.c.bf16 %v271_v6, %v165_v30  ;;  %v431_v10 = vsel %vm428_vm7, %v3677_v5, %v423_v23  ;;  %v325_v29 = vsel %vm322_vm5, %v3659_v15, %v317_v62  ;;  %v369_v30 = vld [vmem:[#allocation6 + $0xb0] sm:$0xff] }
 0x168   :  { %v2552_v37 = vpack.c.bf16 %v272_v41, %v166_v51  ;;  %2525 = vmatprep.subr.bf16.mxu0 %v2524_v14  ;;  %v450_v12 = vrot.slane %v431_v10, 4  ;;  %v344_v43 = vrot.slane %v325_v29, 4  ;;  %v367_v41 = vld [vmem:[#allocation6 + $0xa0] sm:$0xff]  ;;  %v370_v51 = vld [vmem:[#allocation6 + $0xb8] sm:$0xff] }
 0x169   :  { %2527 = vmatpush1.bf16.msra.mxu0 %v2526_v19 }
 0x16a   :  { %2553 = vmatprep.subr.bf16.mxu1 %v2552_v37  ;;  %v319_v13 = vpop.permute.xlu1 %318  ;;  %v292_v16 = vpop.permute.xlu0 %291 }
 0x16b   :  { %2555 = vmatpush1.bf16.msra.mxu1 %v2554_v55  ;;  %v323_v0 = vsel %vm322_vm5, %v319_v13, %v3194_v36  ;;  %v324_v48 = vsel %vm322_vm5, %v317_v62, %v319_v13  ;;  %v300_v5 = vsel %vm297_vm6, %v3679_v47, %v292_v16  ;;  %vm4249_vm5 = vmmov %vm4246_vm1 }
 0x16c   :  { %v345_v52 = vrot.slane %v324_v48, 4  ;;  %v346_v47 = vrot.slane %v323_v0, 4  ;;  %v3808_v38 = vsel %vm142_vm3, %v300_v5, %v344_v43 }
 0x16d   :  { %v376_v13 = vmul.f32 %v368_v50, %v3808_v38  ;;  %v4240_v50 = vld [vmem:[#allocation19_spill] sm:$0xff] }
 0x16e   :  { %v425_v57 = vpop.permute.xlu1 %424  ;;  %v398_v26 = vpop.permute.xlu0 %397 }
 0x16f   :  { %v429_v31 = vsel %vm428_vm7, %v425_v57, %v3192_v35  ;;  %v430_v15 = vsel %vm428_vm7, %v423_v23, %v425_v57  ;;  %v406_v36 = vsel %vm403_vm8, %v3696_v56, %v398_v26  ;;  %v4238_v23 = vld [vmem:[#allocation13_spill] sm:$0xff]  ;;  %vm4251_vm7 = vmmov %vm4245_vm0 }
 0x170   :  { %v3804_v39 = vsel %vm142_vm3, %v406_v36, %v450_v12  ;;  %v451_v35 = vrot.slane %v430_v15, 4  ;;  %v452_v58 = vrot.slane %v429_v31, 4  ;;  %v4239_v36 = vld [vmem:[#allocation18_spill] sm:$0xff] }
 0x171   :  { %v482_v33 = vmul.f32 %v474_v34, %v3804_v39 }
 0x172   :  { %v400_v6 = vpop.permute.xlu1 %399  ;;  %v294_v56 = vpop.permute.xlu0 %293 }
 0x173   :  { %v404_v17 = vsel %vm403_vm8, %v400_v6, %v3257_v25  ;;  %v405_v44 = vsel %vm403_vm8, %v398_v26, %v400_v6  ;;  %v298_v62 = vsel %vm297_vm6, %v294_v56, %v4238_v23  ;;  %v299_v14 = vsel %vm297_vm6, %v292_v16, %v294_v56  ;;  %v685_v56 = vld [vmem:[#allocation6 + $0x160] sm:$0xff]  ;;  %vm4250_vm6 = vmmov %vm4246_vm1 }
 0x174   :  { %v3822_v19 = vsel %vm142_vm3, %v405_v44, %v451_v35  ;;  %v3825_v55 = vsel %vm142_vm3, %v404_v17, %v452_v58  ;;  %v3828_v25 = vsel %vm142_vm3, %v299_v14, %v345_v52  ;;  %v3831_v37 = vsel %vm142_vm3, %v298_v62, %v346_v47  ;;  %v686_v44 = vld [vmem:[#allocation6 + $0x168] sm:$0xff]  ;;  %v579_v23 = vld [vmem:[#allocation6 + $0x120] sm:$0xff]  ;;  %vm4252_vm8 = vmmov %vm4245_vm0 }
 0x175   :  { %v483_v10 = vmul.f32 %v475_v2, %v3822_v19  ;;  %v484_v29 = vmul.f32 %v476_v28, %v3825_v55  ;;  %v375_v16 = vmul.f32 %v367_v41, %v3690_v61  ;;  %v377_v63 = vmul.f32 %v369_v30, %v3828_v25 }
 0x176   :  { %v378_v12 = vmul.f32 %v370_v51, %v3831_v37  ;;  %v529_v0 = vpop.permute.xlu1 %528  ;;  %v527_v48 = vpop.permute.xlu0 %526  ;;  %v2528_v57 = vpack.c.bf16 %v482_v33, %v376_v13  ;;  %v4241_v13 = vld [vmem:[#allocation17_spill] sm:$0xff] }
 0x177   :  { %v2530_v26 = vpack.c.bf16 %v481_v60, %v375_v16  ;;  %v2558_v5 = vpack.c.bf16 %v483_v10, %v377_v63  ;;  %v538_v61 = vsel %vm534_vm10, %v4239_v36, %v527_v48  ;;  %v537_v35 = vsel %vm534_vm10, %v527_v48, %v529_v0 }
 0x178   :  { %2529 = vmatprep.subr.bf16.mxu0 %v2528_v57  ;;  %v2556_v31 = vpack.c.bf16 %v484_v29, %v378_v12  ;;  %v555_v58 = vrot.slane %v538_v61, 4  ;;  %v556_v17 = vrot.slane %v537_v35, 4  ;;  %v580_v29 = vld [vmem:[#allocation6 + $0x128] sm:$0xff] }
 0x179   :  { %2531 = vmatpush1.bf16.msra.mxu0 %v2530_v26  ;;  %v4242_v26 = vld [vmem:[#allocation21_spill] sm:$0xff] }
 0x17a   :  { %v635_v15 = vpop.permute.xlu1 %634  ;;  %v633_v34 = vpop.permute.xlu0 %632  ;;  %2557 = vmatprep.subr.bf16.mxu1 %v2556_v31  ;;  %v571_v62 = vsel %vm142_vm3, %v3708_v18, %v555_v58  ;;  %v4243_v31 = vld [vmem:[#allocation16_spill] sm:$0xff] }
 0x17b   :  { %2559 = vmatpush1.bf16.msra.mxu1 %v2558_v5  ;;  %v643_v47 = vsel %vm640_vm11, %v633_v34, %v635_v15  ;;  %v644_v60 = vsel %vm640_vm11, %v4240_v50, %v633_v34  ;;  %v587_v18 = vmul.f32 %v579_v23, %v571_v62 }
 0x17c   :  { %v661_v33 = vrot.slane %v644_v60, 4  ;;  %v662_v2 = vrot.slane %v643_v47, 4  ;;  %v582_v60 = vld [vmem:[#allocation6 + $0x138] sm:$0xff] }
 0x17e   :  { %v531_v43 = vpop.permute.xlu1 %530  ;;  %v504_v52 = vpop.permute.xlu0 %503 }
 0x17f   :  { %v3852_v28 = vsel %vm509_vm9, %v3698_v7, %v504_v52  ;;  %v535_v10 = vsel %vm534_vm10, %v531_v43, %v4241_v13 }
 0x180   :  { %v572_v16 = vsel %vm142_vm3, %v3852_v28, %v556_v17  ;;  %v558_v36 = vrot.slane %v535_v10, 4  ;;  %v581_v17 = vld [vmem:[#allocation6 + $0x130] sm:$0xff] }
 0x181   :  { %v588_v61 = vmul.f32 %v580_v29, %v572_v16 }
 0x182   :  { %v610_v6 = vpop.permute.xlu1 %609  ;;  %v608_v41 = vpop.permute.xlu0 %607 }
 0x183   :  { %v618_v30 = vsel %vm615_vm12, %v608_v41, %v610_v6  ;;  %v619_v51 = vsel %vm615_vm12, %v3479_v59, %v608_v41  ;;  %v536_v59 = vsel %vm534_vm10, %v529_v0, %v531_v43 }
 0x184   :  { %v677_v14 = vsel %vm142_vm3, %v619_v51, %v661_v33  ;;  %v678_v7 = vsel %vm142_vm3, %v618_v30, %v662_v2  ;;  %v557_v0 = vrot.slane %v536_v59, 4  ;;  %v687_v30 = vld [vmem:[#allocation6 + $0x170] sm:$0xff]  ;;  %v4244_v51 = vld [vmem:[#allocation20_spill] sm:$0xff] }
 0x185   :  { %v693_v63 = vmul.f32 %v685_v56, %v677_v14  ;;  %v694_v12 = vmul.f32 %v686_v44, %v678_v7  ;;  %v688_v56 = vld [vmem:[#allocation6 + $0x178] sm:$0xff] }
 0x186   :  { %v506_v48 = vpop.permute.xlu1 %505  ;;  %v637_v57 = vpop.permute.xlu0 %636 }
 0x187   :  { %v3873_v5 = vsel %vm509_vm9, %v506_v48, %v4242_v26  ;;  %v641_v34 = vsel %vm640_vm11, %v637_v57, %v4243_v31  ;;  %v3880_v47 = vsel %vm509_vm9, %v504_v52, %v506_v48  ;;  %v2534_v43 = vpack.c.bf16 %v693_v63, %v587_v18 }
 0x188   :  { %v642_v50 = vsel %vm640_vm11, %v635_v15, %v637_v57  ;;  %v574_v35 = vsel %vm142_vm3, %v3873_v5, %v558_v36  ;;  %v664_v58 = vrot.slane %v641_v34, 4  ;;  %v2532_v33 = vpack.c.bf16 %v694_v12, %v588_v61  ;;  %v2744_v57 = vld [vmem:[#allocation3 + $0x10] sm:$0xff] }
 0x189   :  { %v573_v44 = vsel %vm142_vm3, %v3880_v47, %v557_v0  ;;  %v663_v52 = vrot.slane %v642_v50, 4  ;;  %v590_v14 = vmul.f32 %v582_v60, %v574_v35  ;;  %v758_v0 = vld [vmem:[#allocation6 + $0x1a0] sm:$0xff]  ;;  %vm4253_vm9 = vcmp.lt.s32.totalorder %v3047_v11, 120 }
 0x18a   :  { %v814_v2 = vpop.permute.xlu1 %813  ;;  %v612_v41 = vpop.permute.xlu0 %611  ;;  %2533 = vmatprep.subr.bf16.mxu0 %v2532_v33  ;;  %v589_v10 = vmul.f32 %v581_v17, %v573_v44  ;;  %v864_v60 = vld [vmem:[#allocation6 + $0x1e0] sm:$0xff]  ;;  %v759_v33 = vld [vmem:[#allocation6 + $0x1a8] sm:$0xff]  ;;  %vm4254_vm10 = vmmov %vm4253_vm9  ;;  %v1100_v11 = vrot.slane %v3873_v5, 4 }
 0x18b   :  { %v616_v23 = vsel %vm615_vm12, %v612_v41, %v4244_v51  ;;  %v617_v15 = vsel %vm615_vm12, %v610_v6, %v612_v41  ;;  %2535 = vmatpush1.bf16.msra.mxu0 %v2534_v43  ;;  %v822_v48 = vsel %vm819_vm13, %v3533_v1, %v814_v2  ;;  %v734_v6 = vrot.slane %v2744_v57, 4  ;;  %v865_v41 = vld [vmem:[#allocation6 + $0x1e8] sm:$0xff]  ;;  %vm4256_vm11 = vmmov %vm4253_vm9 }
 0x18c   :  { %v680_v62 = vsel %vm142_vm3, %v616_v23, %v664_v58  ;;  %v679_v7 = vsel %vm142_vm3, %v617_v15, %v663_v52  ;;  %v840_v61 = vrot.slane %v822_v48, 4  ;;  %v2745_v52 = vld [vmem:[#allocation3 + $0x18] sm:$0xff]  ;;  %v866_v15 = vld [vmem:[#allocation6 + $0x1f0] sm:$0xff]  ;;  %vm4257_vm12 = vmmov %vm4253_vm9 }
 0x18d   :  { %v696_v13 = vmul.f32 %v688_v56, %v680_v62  ;;  %v695_v29 = vmul.f32 %v687_v30, %v679_v7  ;;  %v736_v30 = vrot.slane %v2745_v52, 4 }
 0x18e   :  { %v714_v16 = vpop.permute.xlu1 %713  ;;  %v816_v63 = vpop.permute.xlu0 %815 }
 0x18f   :  { %v2560_v59 = vpack.c.bf16 %v696_v13, %v590_v14  ;;  %v2562_v12 = vpack.c.bf16 %v695_v29, %v589_v10  ;;  %v725_v31 = vsel %vm4245_vm0, %v3559_v24, %v714_v16  ;;  %v821_v34 = vsel %vm819_vm13, %v814_v2, %v816_v63  ;;  %v867_v13 = vld [vmem:[#allocation6 + $0x1f8] sm:$0xff]  ;;  %v760_v29 = vld [vmem:[#allocation6 + $0x1b0] sm:$0xff] }
 0x190   :  { %v750_v43 = vsel %vm142_vm3, %v725_v31, %v734_v6  ;;  %v841_v50 = vrot.slane %v821_v34, 4 }
 0x191   :  { %2561 = vmatprep.subr.bf16.mxu1 %v2560_v59  ;;  %v766_v51 = vmul.f32 %v758_v0, %v750_v43 }
 0x192   :  { %v789_v18 = vpop.permute.xlu1 %788  ;;  %2563 = vmatpush1.bf16.msra.mxu1 %v2562_v12  ;;  %v716_v26 = vpop.permute.xlu0 %715 }
 0x193   :  { %v797_v36 = vsel %vm4246_vm1, %v3578_v54, %v789_v18  ;;  %v724_v1 = vsel %vm4247_vm2, %v714_v16, %v716_v26  ;;  %v761_v16 = vld [vmem:[#allocation6 + $0x1b8] sm:$0xff] }
 0x194   :  { %v856_v35 = vsel %vm142_vm3, %v797_v36, %v840_v61  ;;  %v751_v2 = vsel %vm142_vm3, %v724_v1, %v3283_v27 }
 0x195   :  { %v872_v23 = vmul.f32 %v864_v60, %v856_v35  ;;  %v767_v62 = vmul.f32 %v759_v33, %v751_v2 }
 0x196   :  { %v818_v58 = vpop.permute.xlu1 %817  ;;  %v791_v24 = vpop.permute.xlu0 %790 }
 0x197   :  { %v820_v54 = vsel %vm819_vm13, %v816_v63, %v818_v58  ;;  %v827_v56 = vsel %vm819_vm13, %v818_v58, %v3504_v45  ;;  %v796_v17 = vsel %vm4248_vm4, %v789_v18, %v791_v24  ;;  %v2538_v1 = vpack.c.bf16 %v872_v23, %v766_v51  ;;  %v994_v58 = vld [vmem:[#allocation6 + $0x260] sm:$0xff] }
 0x198   :  { %v857_v44 = vsel %vm142_vm3, %v796_v17, %v841_v50  ;;  %v842_v27 = vrot.slane %v820_v54, 4  ;;  %v843_v14 = vrot.slane %v827_v56, 4  ;;  %v970_v54 = vld [vmem:[#allocation6 + $0x220] sm:$0xff]  ;;  %v971_v56 = vld [vmem:[#allocation6 + $0x228] sm:$0xff] }
 0x199   :  { %v873_v7 = vmul.f32 %v865_v41, %v857_v44  ;;  %v995_v17 = vld [vmem:[#allocation6 + $0x268] sm:$0xff]  ;;  %v1099_v44 = vrot.slane %v3880_v47, 4 }
 0x19a   :  { %v793_v10 = vpop.permute.xlu1 %792  ;;  %v718_v45 = vpop.permute.xlu0 %717 }
 0x19b   :  { %v795_v63 = vsel %vm4249_vm5, %v791_v24, %v793_v10  ;;  %v802_v59 = vsel %vm4250_vm6, %v793_v10, %v3546_v32  ;;  %v722_v12 = vsel %vm4251_vm7, %v718_v45, %v3531_v42  ;;  %v723_v48 = vsel %vm4252_vm8, %v716_v26, %v718_v45  ;;  %v1123_v45 = vld [vmem:[#allocation6 + $0x368] sm:$0xff] }
 0x19c   :  { %v858_v57 = vsel %vm142_vm3, %v795_v63, %v842_v27  ;;  %v859_v6 = vsel %vm142_vm3, %v802_v59, %v843_v14  ;;  %v752_v18 = vsel %vm142_vm3, %v723_v48, %v736_v30  ;;  %v753_v31 = vsel %vm142_vm3, %v722_v12, %v2919_v3  ;;  %v1043_v3 = vld [vmem:[#allocation6 + $0x2e8] sm:$0xff]  ;;  %v996_v12 = vld [vmem:[#allocation6 + $0x270] sm:$0xff] }
 0x19d   :  { %v874_v34 = vmul.f32 %v866_v15, %v858_v57  ;;  %v875_v36 = vmul.f32 %v867_v13, %v859_v6  ;;  %v768_v61 = vmul.f32 %v760_v29, %v752_v18  ;;  %v769_v32 = vmul.f32 %v761_v16, %v753_v31  ;;  %v1019_v30 = vld [vmem:[#allocation6 + $0x2a8] sm:$0xff]  ;;  %v1042_v13 = vld [vmem:[#allocation6 + $0x2e0] sm:$0xff]  ;;  %v972_v48 = vld [vmem:[#allocation6 + $0x230] sm:$0xff] }
 0x19e   :  { %v2536_v0 = vpack.c.bf16 %v873_v7, %v767_v62  ;;  %v922_v43 = vpop.permute.xlu1 %921  ;;  %v920_v42 = vpop.permute.xlu0 %919  ;;  %v1002_v15 = vmul.f32 %v994_v58, %v3750_v21  ;;  %v1051_v62 = vmul.f32 %v1043_v3, %v3828_v25  ;;  %v1003_v7 = vmul.f32 %v995_v17, %v3770_v40  ;;  %v1018_v25 = vld [vmem:[#allocation6 + $0x2a0] sm:$0xff]  ;;  %v997_v31 = vld [vmem:[#allocation6 + $0x278] sm:$0xff] }
 0x19f   :  { %v2566_v50 = vpack.c.bf16 %v874_v34, %v768_v61  ;;  %v927_v26 = vsel %vm925_vm14, %v920_v42, %v922_v43  ;;  %v928_v60 = vsel %vm925_vm14, %v3611_v4, %v920_v42  ;;  %v2564_v35 = vpack.c.bf16 %v875_v36, %v769_v32  ;;  %v4255_v57 = vld [vmem:[#allocation24_spill] sm:$0xff]  ;;  %v1067_v34 = vld [vmem:[#allocation6 + $0x328] sm:$0xff]  ;;  %v973_v32 = vld [vmem:[#allocation6 + $0x238] sm:$0xff] }
 0x1a0   :  { %2537 = vmatprep.subr.bf16.mxu0 %v2536_v0  ;;  %v946_v24 = vrot.slane %v928_v60, 4  ;;  %v947_v33 = vrot.slane %v927_v26, 4  ;;  %v1098_v10 = vrot.slane %v3852_v28, 4  ;;  %v1115_v63 = vsel %vm142_vm3, %v3880_v47, %v1099_v44  ;;  %v4258_v58 = vld [vmem:[#allocation12_spill] sm:$0xff] }
 0x1a1   :  { %2539 = vmatpush1.bf16.msra.mxu0 %v2538_v1  ;;  %2565 = vmatprep.subr.bf16.mxu1 %v2564_v35  ;;  %v1122_v1 = vld [vmem:[#allocation6 + $0x360] sm:$0xff]  ;;  %v1004_v26 = vmul.f32 %v996_v12, %v3773_v9  ;;  %v1005_v3 = vmul.f32 %v997_v31, %v4258_v58 }
 0x1a2   :  { %v897_v2 = vpop.permute.xlu1 %896  ;;  %2567 = vmatpush1.bf16.msra.mxu1 %v2566_v50  ;;  %v895_v41 = vpop.permute.xlu0 %894  ;;  %v1114_v0 = vsel %vm142_vm3, %v3852_v28, %v1098_v10  ;;  %v1075_v28 = vmul.f32 %v1067_v34, %v3822_v19  ;;  %v1116_v19 = vsel %vm142_vm3, %v3873_v5, %v1100_v11  ;;  %v4263_v5 = vld [vmem:[#allocation22_spill] sm:$0xff] }
 0x1a3   :  { %v902_v52 = vsel %vm4253_vm9, %v895_v41, %v897_v2  ;;  %v903_v4 = vsel %vm4254_vm10, %v3644_v53, %v895_v41  ;;  %v1027_v53 = vmul.f32 %v1019_v30, %v3764_v46  ;;  %v1050_v46 = vmul.f32 %v1042_v13, %v3808_v38 }
 0x1a4   :  { %v962_v51 = vsel %vm142_vm3, %v903_v4, %v946_v24  ;;  %v963_v23 = vsel %vm142_vm3, %v902_v52, %v947_v33  ;;  %v1026_v38 = vmul.f32 %v1018_v25, %v3746_v22  ;;  %v1066_v24 = vld [vmem:[#allocation6 + $0x320] sm:$0xff]  ;;  %v1044_v33 = vld [vmem:[#allocation6 + $0x2f0] sm:$0xff] }
 0x1a5   :  { %v978_v27 = vmul.f32 %v970_v54, %v962_v51  ;;  %v979_v14 = vmul.f32 %v971_v56, %v963_v23  ;;  %v2544_v61 = vpack.c.bf16 %v1051_v62, %v1027_v53  ;;  %v1130_v54 = vmul.f32 %v1122_v1, %v1114_v0  ;;  %v1020_v22 = vld [vmem:[#allocation6 + $0x2b0] sm:$0xff]  ;;  %v4259_v23 = vld [vmem:[#allocation15_spill] sm:$0xff] }
 0x1a6   :  { %v899_v29 = vpop.permute.xlu1 %898  ;;  %v924_v16 = vpop.permute.xlu0 %923  ;;  %v1074_v17 = vmul.f32 %v1066_v24, %v3804_v39  ;;  %v1052_v44 = vmul.f32 %v1044_v33, %v3831_v37  ;;  %v1124_v52 = vld [vmem:[#allocation6 + $0x370] sm:$0xff]  ;;  %v1028_v4 = vmul.f32 %v1020_v22, %v3767_v49  ;;  %v2841_v37 = vmov 1.0|1.0   ;;  %v4262_v49 = vld [vmem:[#allocation23_spill] sm:$0xff] }
 0x1a7   :  { %v2542_v59 = vpack.c.bf16 %v1002_v15, %v978_v27  ;;  %v926_v21 = vsel %vm925_vm14, %v922_v43, %v924_v16  ;;  %v933_v40 = vsel %vm925_vm14, %v924_v16, %v4255_v57  ;;  %v2540_v18 = vpack.c.bf16 %v1003_v7, %v979_v14  ;;  %v1068_v51 = vld [vmem:[#allocation6 + $0x330] sm:$0xff] }
 0x1a8   :  { %v948_v6 = vrot.slane %v926_v21, 4  ;;  %v901_v47 = vsel %vm4256_vm11, %v897_v2, %v899_v29  ;;  %v949_v36 = vrot.slane %v933_v40, 4  ;;  %v1131_v43 = vmul.f32 %v1123_v45, %v1115_v63  ;;  %v4260_v15 = vld [vmem:[#allocation14_spill] sm:$0xff] }
 0x1a9   :  { %v908_v42 = vsel %vm4257_vm12, %v899_v29, %v3609_v20  ;;  %2541 = vmatprep.subr.bf16.mxu0 %v2540_v18  ;;  %v2546_v2 = vpack.c.bf16 %v1050_v46, %v1026_v38  ;;  %v2550_v30 = vpack.c.bf16 %v1130_v54, %v1074_v17  ;;  %v4261_v62 = vpack.c.bf16 %v4259_v23, %v4260_v15 }
 0x1aa   :  { %v964_v50 = vsel %vm142_vm3, %v901_v47, %v948_v6  ;;  %v965_v60 = vsel %vm142_vm3, %v908_v42, %v949_v36  ;;  %2543 = vmatpush1.bf16.msra.mxu0 %v2542_v59  ;;  %v2548_v41 = vpack.c.bf16 %v1131_v43, %v1075_v28  ;;  %v2574_v27 = vpack.c.bf16 %v1052_v44, %v1028_v4 }
 0x1ab   :  { %v980_v35 = vmul.f32 %v972_v48, %v964_v50  ;;  %2545 = vmatprep.subr.bf16.mxu0 %v2544_v61  ;;  %v981_v20 = vmul.f32 %v973_v32, %v965_v60  ;;  %v1132_v39 = vmul.f32 %v1124_v52, %v1116_v19  ;;  %v1076_v14 = vmul.f32 %v1068_v51, %v3825_v55 }
 0x1ac   :  { %v4264_v7 = vpack.c.bf16 %v4262_v49, %v4263_v5  ;;  %v2842_v59 = vmov 0  }
 0x1ad   :  { %v2570_v56 = vpack.c.bf16 %v1004_v26, %v980_v35  ;;  %v2568_v9 = vpack.c.bf16 %v1005_v3, %v981_v20  ;;  %v2578_v13 = vpack.c.bf16 %v1132_v39, %v1076_v14  ;;  %2736 = vset.pattern.permute.xlu0 %v2842_v59  ;;  %2737 = vset.pattern.permute.xlu1 %v2842_v59  ;;  %v2126_v14 = vld [vmem:[%s4198_s3] sm:$0xff]  ;;  %s2790_s3 = scalar_lea.vmem %s2172_s16, 1024 }
 0x1ae   :  { %2547 = vmatpush1.bf16.msra.mxu0 %v2546_v2  ;;  %p2791_p2 = scmp.ne.s32.totalorder %s2172_s16, %s2790_s3  ;;  %p2796_p4 = scmp.lt.s32.totalorder %s2790_s3, %s2790_s3 }
 0x1af   :  { %2549 = vmatprep.subr.bf16.mxu0 %v2548_v41  ;;  %2569 = vmatprep.subr.bf16.mxu1 %v2568_v9 }
 0x1b0   :  { %2571 = vmatpush1.bf16.msra.mxu1 %v2570_v56  ;;  %p2797_p5 = por %p2796_p4, %p2795_p3 }
 0x1b1   :  { %2573 = vmatprep.subr.bf16.mxu1 %v4261_v62 }
 0x1b2   :  { %2551 = vmatpush1.bf16.msra.mxu0 %v2550_v30  ;;  %p2798_p6 = pnand %p2797_p5, %p2791_p2 }
 0x1b3   :  { %2580 = vmatprep.subr.bf16.mxu0 %v2841_v37 }
 0x1b4   :  { %2575 = vmatpush1.bf16.msra.mxu1 %v2574_v27 }
 0x1b5   :  { %2186 = vmatmul.mubr.msk.f32.vlgmr.msra.gmra.mrb[2].mxu0 %vm1255_vm15, %v3674_v8  ;;  %2577 = vmatprep.subr.bf16.mxu1 %v4264_v7  ;;  %v2143_v7 = vld [vmem:[%s4199_s4] sm:$0xff] }
 0x1b6   :  { %2581 = vmatpush3.bf16.msra.mxu0 %v2841_v37 }
 0x1b7   :  { %2582 = vmatprep.subr.bf16.mxu0 %v2841_v37 }
 0x1b8   :  { %2579 = vmatpush1.bf16.msra.mxu1 %v2578_v13 }
 0x1b9   :  { %2596 = vmatprep.subr.bf16.mxu1 %v2841_v37 }
 0x1ba   :  { %2583 = vmatpush3.bf16.msra.mxu0 %v2841_v37 }
 0x1bb   :  { %2187 = vmatmul.mubr.msk.f32.vlgmr.msra.gmra.mrb[2].mxu1 %vm1255_vm15, %v3674_v8  ;;  %2584 = vmatprep.subr.bf16.mxu0 %v2841_v37 }
 0x1bc   :  { %2597 = vmatpush3.bf16.msra.mxu1 %v2841_v37 }
 0x1bd   :  { %2598 = vmatprep.subr.bf16.mxu1 %v2841_v37 }
 0x1be   :  { %2585 = vmatpush3.bf16.msra.mxu0 %v2841_v37 }
 0x1bf   :  { %2586 = vmatprep.subr.bf16.mxu0 %v2841_v37 }
 0x1c0   :  { %2599 = vmatpush3.bf16.msra.mxu1 %v2841_v37 }
 0x1c1   :  { %2600 = vmatprep.subr.bf16.mxu1 %v2841_v37 }
 0x1c2   :  { %2587 = vmatpush3.bf16.msra.mxu0 %v2841_v37 }
 0x1c3   :  { %2588 = vmatprep.subr.bf16.mxu0 %v2841_v37 }
 0x1c4   :  { %2601 = vmatpush3.bf16.msra.mxu1 %v2841_v37 }
 0x1c5   :  { %2602 = vmatprep.subr.bf16.mxu1 %v2841_v37 }
 0x1c6   :  { %2589 = vmatpush3.bf16.msra.mxu0 %v2841_v37 }
 0x1c7   :  { %2590 = vmatprep.subr.bf16.mxu0 %v2841_v37 }
 0x1c8   :  { %2603 = vmatpush3.bf16.msra.mxu1 %v2841_v37 }
 0x1c9   :  { %2604 = vmatprep.subr.bf16.mxu1 %v2841_v37 }
 0x1ca   :  { %2591 = vmatpush3.bf16.msra.mxu0 %v2841_v37 }
 0x1cb   :  { %2592 = vmatprep.subr.bf16.mxu0 %v2841_v37 }
 0x1cc   :  { %2605 = vmatpush3.bf16.msra.mxu1 %v2841_v37 }
 0x1cd   :  { %2606 = vmatprep.subr.bf16.mxu1 %v2841_v37 }
 0x1ce   :  { %2593 = vmatpush3.bf16.msra.mxu0 %v2841_v37 }
 0x1cf   :  { %2594 = vmatprep.subr.bf16.mxu0 %v2841_v37 }
 0x1d0   :  { %2607 = vmatpush3.bf16.msra.mxu1 %v2841_v37 }
 0x1d1   :  { %2608 = vmatprep.subr.bf16.mxu1 %v2841_v37 }
 0x1d2   :  { %2595 = vmatpush3.bf16.msra.mxu0 %v2841_v37 }
 0x1d3   :  { %2612 = vmatprep.subr.bf16.mxu0 %v2841_v37 }
 0x1d4   :  { %2609 = vmatpush3.bf16.msra.mxu1 %v2841_v37 }
 0x1d5   :  { %2610 = vmatprep.subr.bf16.mxu1 %v2841_v37 }
 0x1d8   :  { %2611 = vmatpush3.bf16.msra.mxu1 %v2841_v37 }
 0x1d9   :  { %2628 = vmatprep.subr.bf16.mxu1 %v2841_v37 }
 0x223   :  { %v4025_v8 = vpop.f32.mrb[0].mxu0 }
 0x224   :  { %v4027_v55 = vpop.f32.mrb[1].mxu0 }
 0x225   :  { %1607 = vmatprep.mubr.f32.mxu0 %v4027_v55 }
 0x226   :  { %1608 = vmatmul.mubr.f32.vlgmr.msra.gmra.mrb[4].mxu0 %v4025_v8 }
 0x227   :  { %2613 = vmatpush3.bf16.msra.mxu0 %v2841_v37 }
 0x228   :  { %2614 = vmatprep.subr.bf16.mxu0 %v2841_v37 }
 0x22b   :  { %2615 = vmatpush3.bf16.msra.mxu0 %v2841_v37 }
 0x22c   :  { %2616 = vmatprep.subr.bf16.mxu0 %v2841_v37 }
 0x22f   :  { %2617 = vmatpush3.bf16.msra.mxu0 %v2841_v37 }
 0x230   :  { %2618 = vmatprep.subr.bf16.mxu0 %v2841_v37 }
 0x232   :  { %v4037_v10 = vpop.f32.mrb[0].mxu1 }
 0x233   :  { %v4039_v29 = vpop.f32.mrb[1].mxu1  ;;  %2619 = vmatpush3.bf16.msra.mxu0 %v2841_v37 }
 0x234   :  { %1677 = vmatprep.mubr.f32.mxu1 %v4039_v29  ;;  %2620 = vmatprep.subr.bf16.mxu0 %v2841_v37 }
 0x235   :  { %1678 = vmatmul.mubr.f32.vlgmr.msra.gmra.mrb[4].mxu1 %v4037_v10 }
 0x236   :  { %2629 = vmatpush3.bf16.msra.mxu1 %v2841_v37 }
 0x237   :  { %2630 = vmatprep.subr.bf16.mxu1 %v2841_v37  ;;  %2621 = vmatpush3.bf16.msra.mxu0 %v2841_v37 }
 0x238   :  { %2622 = vmatprep.subr.bf16.mxu0 %v2841_v37 }
 0x23a   :  { %2631 = vmatpush3.bf16.msra.mxu1 %v2841_v37 }
 0x23b   :  { %2632 = vmatprep.subr.bf16.mxu1 %v2841_v37  ;;  %2623 = vmatpush3.bf16.msra.mxu0 %v2841_v37 }
 0x23c   :  { %2624 = vmatprep.subr.bf16.mxu0 %v2841_v37 }
 0x23e   :  { %2633 = vmatpush3.bf16.msra.mxu1 %v2841_v37 }
 0x23f   :  { %2634 = vmatprep.subr.bf16.mxu1 %v2841_v37  ;;  %2625 = vmatpush3.bf16.msra.mxu0 %v2841_v37 }
 0x240   :  { %2626 = vmatprep.subr.bf16.mxu0 %v2841_v37 }
 0x242   :  { %2635 = vmatpush3.bf16.msra.mxu1 %v2841_v37 }
 0x243   :  { %2636 = vmatprep.subr.bf16.mxu1 %v2841_v37  ;;  %2627 = vmatpush3.bf16.msra.mxu0 %v2841_v37 }
 0x244   :  { %2644 = vmatprep.subr.bf16.mxu0 %v2841_v37 }
 0x246   :  { %2637 = vmatpush3.bf16.msra.mxu1 %v2841_v37 }
 0x247   :  { %2638 = vmatprep.subr.bf16.mxu1 %v2841_v37 }
 0x24a   :  { %2639 = vmatpush3.bf16.msra.mxu1 %v2841_v37 }
 0x24b   :  { %2640 = vmatprep.subr.bf16.mxu1 %v2841_v37 }
 0x24e   :  { %2641 = vmatpush3.bf16.msra.mxu1 %v2841_v37 }
 0x24f   :  { %2642 = vmatprep.subr.bf16.mxu1 %v2841_v37 }
 0x252   :  { %2643 = vmatpush3.bf16.msra.mxu1 %v2841_v37 }
 0x253   :  { %2660 = vmatprep.subr.bf16.mxu1 %v2841_v37 }
 0x288   :  { %v4069_v16 = vpop.f32.mrb[2].mxu0 }
 0x289   :  { %v4071_v53 = vpop.f32.mrb[3].mxu0 }
 0x28a   :  { %1747 = vmatprep.mubr.f32.mxu0 %v4071_v53 }
 0x28b   :  { %1748 = vmatmul.mubr.f32.vlgmr.msra.gmra.mrb[6].mxu0 %v4069_v16 }
 0x28c   :  { %2645 = vmatpush3.bf16.msra.mxu0 %v2841_v37 }
 0x28d   :  { %2646 = vmatprep.subr.bf16.mxu0 %v2841_v37 }
 0x28e   :  { %v4077_v45 = vpop.f32.mrb[2].mxu1 }
 0x28f   :  { %v1540_v63 = vpop.f32.mrb[3].mxu1 }
 0x290   :  { %1817 = vmatprep.mubr.f32.mxu1 %v1540_v63  ;;  %2647 = vmatpush3.bf16.msra.mxu0 %v2841_v37 }
 0x291   :  { %1818 = vmatmul.mubr.f32.vlgmr.msra.gmra.mrb[6].mxu1 %v4077_v45  ;;  %2648 = vmatprep.subr.bf16.mxu0 %v2841_v37 }
 0x292   :  { %2661 = vmatpush3.bf16.msra.mxu1 %v2841_v37 }
 0x293   :  { %2662 = vmatprep.subr.bf16.mxu1 %v2841_v37 }
 0x294   :  { %2649 = vmatpush3.bf16.msra.mxu0 %v2841_v37 }
 0x295   :  { %2650 = vmatprep.subr.bf16.mxu0 %v2841_v37 }
 0x296   :  { %2663 = vmatpush3.bf16.msra.mxu1 %v2841_v37 }
 0x297   :  { %2664 = vmatprep.subr.bf16.mxu1 %v2841_v37 }
 0x298   :  { %2651 = vmatpush3.bf16.msra.mxu0 %v2841_v37 }
 0x299   :  { %2652 = vmatprep.subr.bf16.mxu0 %v2841_v37 }
 0x29a   :  { %2665 = vmatpush3.bf16.msra.mxu1 %v2841_v37 }
 0x29b   :  { %2666 = vmatprep.subr.bf16.mxu1 %v2841_v37 }
 0x29c   :  { %2653 = vmatpush3.bf16.msra.mxu0 %v2841_v37 }
 0x29d   :  { %2654 = vmatprep.subr.bf16.mxu0 %v2841_v37 }
 0x29e   :  { %2667 = vmatpush3.bf16.msra.mxu1 %v2841_v37 }
 0x29f   :  { %2668 = vmatprep.subr.bf16.mxu1 %v2841_v37 }
 0x2a0   :  { %2655 = vmatpush3.bf16.msra.mxu0 %v2841_v37 }
 0x2a1   :  { %2656 = vmatprep.subr.bf16.mxu0 %v2841_v37 }
 0x2a2   :  { %2669 = vmatpush3.bf16.msra.mxu1 %v2841_v37 }
 0x2a3   :  { %2670 = vmatprep.subr.bf16.mxu1 %v2841_v37 }
 0x2a4   :  { %2657 = vmatpush3.bf16.msra.mxu0 %v2841_v37 }
 0x2a5   :  { %2658 = vmatprep.subr.bf16.mxu0 %v2841_v37 }
 0x2a6   :  { %2671 = vmatpush3.bf16.msra.mxu1 %v2841_v37 }
 0x2a7   :  { %2672 = vmatprep.subr.bf16.mxu1 %v2841_v37 }
 0x2a8   :  { %2659 = vmatpush3.bf16.msra.mxu0 %v2841_v37 }
 0x2a9   :  { %2676 = vmatprep.subr.bf16.mxu0 %v2841_v37 }
 0x2aa   :  { %2673 = vmatpush3.bf16.msra.mxu1 %v2841_v37 }
 0x2ab   :  { %2674 = vmatprep.subr.bf16.mxu1 %v2841_v37 }
 0x2ae   :  { %2675 = vmatpush3.bf16.msra.mxu1 %v2841_v37 }
 0x2af   :  { %2692 = vmatprep.subr.bf16.mxu1 %v2841_v37 }
 0x2f9   :  { %v2220_v21 = vpop.f32.mrb[4].mxu0 }
 0x2fa   :  { %v2221_v25 = vpop.f32.mrb[5].mxu0 }
 0x2fb   :  { %v2222_v12 = vadd.f32 %v2221_v25, %v2220_v21 }
 0x308   :  { %v2255_v48 = vpop.f32.mrb[4].mxu1 }
 0x309   :  { %v2256_v57 = vpop.f32.mrb[5].mxu1 }
 0x30a   :  { %v2257_v40 = vadd.f32 %v2256_v57, %v2255_v48 }
 0x30c   :  { %v1680_v6 = vadd.f32 %v2257_v40, %v2222_v12 }
 0x35e   :  { %v2290_v18 = vpop.f32.mrb[6].mxu0 }
 0x35f   :  { %v2291_v31 = vpop.f32.mrb[7].mxu0 }
 0x360   :  { %v2292_v46 = vadd.f32 %v2291_v31, %v2290_v18 }
 0x362   :  { %v1750_v34 = vadd.f32 %v2292_v46, %v1680_v6 }
 0x364   :  { %v2325_v47 = vpop.f32.mrb[6].mxu1 }
 0x365   :  { %v2326_v36 = vpop.f32.mrb[7].mxu1 }
 0x366   :  { %v2327_v61 = vadd.f32 %v2326_v36, %v2325_v47 }
 0x368   :  { %v1820_v32 = vadd.f32 %v2327_v61, %v1750_v34 }
 0x36a   :  { %v1823_v1 = vmul.f32 0.0009765625, %v1820_v32 }
 0x36c   :  { %1826 = vperm.xlu0 %2736, %v1823_v1  }
 0x3eb   :  { %v1827_v0 = vpop.permute.xlu0 %1826 }
 0x3ec   :  { %v4111_v43 = vsub.f32 %v4027_v55, %v1827_v0  ;;  %v4114_v42 = vsub.f32 %v4039_v29, %v1827_v0  ;;  %v4117_v50 = vsub.f32 %v4025_v8, %v1827_v0  ;;  %v4120_v38 = vsub.f32 %v4037_v10, %v1827_v0 }
 0x3ed   :  { %v4123_v26 = vsub.f32 %v4071_v53, %v1827_v0  ;;  %v4125_v60 = vsub.f32 %v1540_v63, %v1827_v0  ;;  %v1833_v11 = vsub.f32 %v4069_v16, %v1827_v0  ;;  %v1835_v20 = vsub.f32 %v4077_v45, %v1827_v0 }
 0x3ee   :  { %v1838_v35 = vmul.f32 %v4111_v43, %v4111_v43  ;;  %v1840_v58 = vmul.f32 %v4114_v42, %v4114_v42  ;;  %v1837_v3 = vmul.f32 %v4117_v50, %v4117_v50  ;;  %v1839_v24 = vmul.f32 %v4120_v38, %v4120_v38 }
 0x3ef   :  { %v1842_v28 = vmul.f32 %v4123_v26, %v4123_v26  ;;  %v1844_v33 = vmul.f32 %v4125_v60, %v4125_v60  ;;  %v1841_v2 = vmul.f32 %v1833_v11, %v1833_v11  ;;  %v1843_v54 = vmul.f32 %v1835_v20, %v1835_v20 }
 0x3f0   :  { %1909 = vmatprep.mubr.f32.mxu0 %v1838_v35  ;;  %1979 = vmatprep.mubr.f32.mxu1 %v1840_v58 }
 0x3f1   :  { %1910 = vmatmul.mubr.f32.vlgmr.msra.gmra.mrb[8].mxu0 %v1837_v3  ;;  %1980 = vmatmul.mubr.f32.vlgmr.msra.gmra.mrb[8].mxu1 %v1839_v24 }
 0x3f2   :  { %2677 = vmatpush3.bf16.msra.mxu0 %v2841_v37  ;;  %2693 = vmatpush3.bf16.msra.mxu1 %v2841_v37 }
 0x3f3   :  { %2049 = vmatprep.mubr.f32.mxu0 %v1842_v28  ;;  %2119 = vmatprep.mubr.f32.mxu1 %v1844_v33 }
 0x3f4   :  { %2678 = vmatprep.subr.bf16.mxu0 %v2841_v37  ;;  %2694 = vmatprep.subr.bf16.mxu1 %v2841_v37 }
 0x3f6   :  { %2679 = vmatpush3.bf16.msra.mxu0 %v2841_v37  ;;  %2695 = vmatpush3.bf16.msra.mxu1 %v2841_v37 }
 0x3f7   :  { %2680 = vmatprep.subr.bf16.mxu0 %v2841_v37  ;;  %2696 = vmatprep.subr.bf16.mxu1 %v2841_v37 }
 0x3fa   :  { %2681 = vmatpush3.bf16.msra.mxu0 %v2841_v37  ;;  %2697 = vmatpush3.bf16.msra.mxu1 %v2841_v37 }
 0x3fb   :  { %2682 = vmatprep.subr.bf16.mxu0 %v2841_v37  ;;  %2698 = vmatprep.subr.bf16.mxu1 %v2841_v37 }
 0x3fe   :  { %2683 = vmatpush3.bf16.msra.mxu0 %v2841_v37  ;;  %2699 = vmatpush3.bf16.msra.mxu1 %v2841_v37 }
 0x3ff   :  { %2684 = vmatprep.subr.bf16.mxu0 %v2841_v37  ;;  %2700 = vmatprep.subr.bf16.mxu1 %v2841_v37 }
 0x402   :  { %2685 = vmatpush3.bf16.msra.mxu0 %v2841_v37  ;;  %2701 = vmatpush3.bf16.msra.mxu1 %v2841_v37 }
 0x403   :  { %2686 = vmatprep.subr.bf16.mxu0 %v2841_v37  ;;  %2702 = vmatprep.subr.bf16.mxu1 %v2841_v37 }
 0x406   :  { %2687 = vmatpush3.bf16.msra.mxu0 %v2841_v37  ;;  %2703 = vmatpush3.bf16.msra.mxu1 %v2841_v37 }
 0x407   :  { %2688 = vmatprep.subr.bf16.mxu0 %v2841_v37  ;;  %2704 = vmatprep.subr.bf16.mxu1 %v2841_v37 }
 0x40a   :  { %2689 = vmatpush3.bf16.msra.mxu0 %v2841_v37  ;;  %2705 = vmatpush3.bf16.msra.mxu1 %v2841_v37 }
 0x40b   :  { %2690 = vmatprep.subr.bf16.mxu0 %v2841_v37  ;;  %2706 = vmatprep.subr.bf16.mxu1 %v2841_v37 }
 0x40e   :  { %2691 = vmatpush3.bf16.msra.mxu0 %v2841_v37  ;;  %2707 = vmatpush3.bf16.msra.mxu1 %v2841_v37 }
 0x411   :  { %2050 = vmatmul.mubr.f32.vlgmr.msra.gmra.mrb[10].mxu0 %v1841_v2  ;;  %2120 = vmatmul.mubr.f32.vlgmr.msra.gmra.mrb[10].mxu1 %v1843_v54 }
 0x4c4   :  { %v2360_v56 = vpop.f32.mrb[8].mxu0  ;;  %v2395_v22 = vpop.f32.mrb[8].mxu1 }
 0x4c5   :  { %v2361_v41 = vpop.f32.mrb[9].mxu0  ;;  %v2396_v9 = vpop.f32.mrb[9].mxu1 }
 0x4c6   :  { %v2362_v17 = vadd.f32 %v2361_v41, %v2360_v56  ;;  %v2397_v44 = vadd.f32 %v2396_v9, %v2395_v22 }
 0x4c8   :  { %v1982_v52 = vadd.f32 %v2397_v44, %v2362_v17 }
 0x4e4   :  { %v2430_v19 = vpop.f32.mrb[10].mxu0  ;;  %v2465_v4 = vpop.f32.mrb[10].mxu1 }
 0x4e5   :  { %v2431_v30 = vpop.f32.mrb[11].mxu0  ;;  %v2466_v51 = vpop.f32.mrb[11].mxu1 }
 0x4e6   :  { %v2432_v23 = vadd.f32 %v2431_v30, %v2430_v19  ;;  %v2467_v15 = vadd.f32 %v2466_v51, %v2465_v4 }
 0x4e8   :  { %v2052_v62 = vadd.f32 %v2432_v23, %v1982_v52 }
 0x4ea   :  { %v2122_v27 = vadd.f32 %v2467_v15, %v2052_v62 }
 0x4ec   :  { %v2125_v39 = vmul.f32 0.0009765625, %v2122_v27 }
 0x4ee   :  { %v2127_v37 = vadd.f32 0.001, %v2125_v39 }
 0x4f0   :  { %2742 = vrsqrt.f32 %v2127_v37 }
 0x4fa   :  { %v2743_v49 = vpop.eup %2742 }
 0x4fb   :  { %v2129_v5 = vmul.f32 %v2743_v49, %v2126_v14 }
 0x4fd   :  { %2132 = vperm.xlu1 %2737, %v2129_v5  }
 0x501   :  { %2146 = vperm.xlu1 %2737, %v2143_v7  }
 0x57c   :  { %v2133_v13 = vpop.permute.xlu1 %2132 }
 0x57d   :  { %v2135_v8 = vmul.f32 %v2133_v13, %v4117_v50  ;;  %v2136_v55 = vmul.f32 %v2133_v13, %v4111_v43  ;;  %v2137_v10 = vmul.f32 %v2133_v13, %v4120_v38  ;;  %v2138_v29 = vmul.f32 %v2133_v13, %v4114_v42 }
 0x57e   :  { %v2139_v16 = vmul.f32 %v2133_v13, %v1833_v11  ;;  %v2140_v53 = vmul.f32 %v2133_v13, %v4123_v26  ;;  %v2141_v45 = vmul.f32 %v2133_v13, %v1835_v20  ;;  %v2142_v63 = vmul.f32 %v2133_v13, %v4125_v60 }
 0x580   :  { %v2147_v59 = vpop.permute.xlu1 %2146 }
 0x581   :  { %v2149_v21 = vadd.f32 %v2147_v59, %v2135_v8  ;;  %v2150_v25 = vadd.f32 %v2147_v59, %v2136_v55  ;;  %v2151_v12 = vadd.f32 %v2147_v59, %v2137_v10  ;;  %v2152_v48 = vadd.f32 %v2147_v59, %v2138_v29 }
 0x582   :  { %v2153_v57 = vadd.f32 %v2147_v59, %v2139_v16  ;;  %v2154_v40 = vadd.f32 %v2147_v59, %v2140_v53  ;;  %v2155_v6 = vadd.f32 %v2147_v59, %v2141_v45  ;;  %v2156_v18 = vadd.f32 %v2147_v59, %v2142_v63 }
 0x583   :  { %2157 = vst [vmem:[#allocation8] sm:$0xff] %v2149_v21  ;;  %2158 = vst [vmem:[#allocation8 + $0x8] sm:$0xff] %v2150_v25 }
 0x584   :  { %2159 = vst [vmem:[#allocation8 + $0x10] sm:$0xff] %v2151_v12  ;;  %2160 = vst [vmem:[#allocation8 + $0x18] sm:$0xff] %v2152_v48 }
 0x585   :  { %2162 = vst [vmem:[#allocation8 + $0x20] sm:$0xff] %v2153_v57  ;;  %2163 = vst [vmem:[#allocation8 + $0x28] sm:$0xff] %v2154_v40 }
 0x586   :  { %2164 = vst [vmem:[#allocation8 + $0x30] sm:$0xff] %v2155_v6  ;;  %2165 = vst [vmem:[#allocation8 + $0x38] sm:$0xff] %v2156_v18 }
 0x587   :  { %2801 = shalt.err (!%p2798_p6)
}
 0x588   :  { %s2802_s17 = scalar_lea.hbm %s4200_s5, 1024 }
 0x589   :  { %p2803_p7 = scmp.ne.s32.totalorder %s4200_s5, %s2802_s17  ;;  %p2806_p8 = scmp.lt.u32.totalorder %s2802_s17, %s4200_s5 }
 0x58b   :  { %p2808_p9 = pnand %p2806_p8, %p2803_p7 }
 0x58d   :  { %2811 = shalt.err (!%p2808_p9)
}
 0x58e   :  { %s2844_s2 = smov 512   ;;  %s2845_s22 = smov 32  }
 0x58f   :  { %2177 = dma.vmem_to_hbm [thread:$0]  %s2172_s16, 1024, %s4200_s5, [#allocation5], %s2844_s2, %s2844_s2, %s2845_s22  }
 0x590   :  { %2816 = dma.done.wait [#allocation5], 1024  }
 0x591   :  { %2817 = vsyncadd [#allocation5], 4294966272 }
 0x592   :  { %2181 = vsyncpa [#allocation4], 1 }
 0x593   :  { %2182 = vsyncpa [#allocation7], 1 }
 0x594   :  { %2183 = vsyncpa [#allocation5], 1 }

</bundles_post_ra>
